<compile_context>
chip_gen: v7x
topology: tpu7x:2x2x1
jax: 0.10.0
libtpu: 0.0.40
codegen_flags: <defaults>
</compile_context>

<pallas_src>
import functools

import jax
import jax.numpy as jnp
from jax.experimental import pallas as pl
from jax.experimental.pallas import tpu as pltpu


def lstm_forecaster_kernel(x_ref, wih0_ref, b0_ref, wfused_ref, whh1_ref,
                           b1_ref, wfc_ref, bfc_ref, out_ref, *, out_is_scalar):
    """2-layer LSTM recurrence + final Linear for one batch tile, all in VMEM.

    Gate column order everywhere is [i, f, o, g] (reordered in the wrapper).
    """
    T, B, I = x_ref.shape            # time-major batch tile
    H = whh1_ref.shape[0]
    H4 = 4 * H

    # ---- Hoist all weight / bias loads out of the recurrence ----------------
    wih0 = wih0_ref[...]                                    # (I, 4H)
    b0 = b0_ref[...]                                        # (1, 4H)
    wfused = wfused_ref[...]                                # (H, 8H) = [W_hh0 | W_ih1]
    whh1 = whh1_ref[...]                                    # (H, 4H)
    b1 = jnp.broadcast_to(b1_ref[...], (B, H4))             # hoisted broadcast
    wfc = wfc_ref[...]                                      # (1, H) or (H, out)
    bfc = bfc_ref[...]                                      # (1, out)

    # ---- Layer-0 input projection for ALL timesteps in one MXU pass ---------
    # Time-major, so each per-step slice below is a contiguous sublane-aligned
    # block of B rows (B is a multiple of 8).
    x2 = x_ref[...].reshape(T * B, I)
    g0_all = jnp.dot(x2, wih0, preferred_element_type=jnp.float32) + b0  # (T*B, 4H)

    def gates_to_hc(gates, c_prev):
        # [i, f, o, g] order: one contiguous sigmoid block + one tanh block.
        sig = jax.nn.sigmoid(gates[:, :3 * H])
        g = jnp.tanh(gates[:, 3 * H:])
        i = sig[:, 0 * H:1 * H]
        f = sig[:, 1 * H:2 * H]
        o = sig[:, 2 * H:3 * H]
        c = f * c_prev + i * g
        h = o * jnp.tanh(c)
        return h, c

    zeros_h = jnp.zeros((B, H), jnp.float32)
    zeros_g = jnp.zeros((B, H4), jnp.float32)
    c0 = zeros_h
    h1 = zeros_h
    c1 = zeros_h
    rec0 = zeros_g                    # h0_{-1} @ W_hh0 == 0

    # ---- Fully unrolled time loop (T is small & static) ---------------------
    for t in range(T):
        if t == 0:
            rec1 = zeros_g                                   # h1_{-1} == 0
            g0 = g0_all[:B, :]                               # rec0 == 0
        else:
            # Layer-1 recurrent dot depends only on h1 from the previous step:
            # independent of this step's layer-0 work -> off the critical path.
            rec1 = jnp.dot(h1, whh1, preferred_element_type=jnp.float32)
            g0 = g0_all[t * B:(t + 1) * B, :] + rec0

        # ---- layer 0, step t
        h0, c0 = gates_to_hc(g0, c0)

        # ---- single fused MXU issue: [h0_t @ W_hh0 | h0_t @ W_ih1]
        fused = jnp.dot(h0, wfused, preferred_element_type=jnp.float32)  # (B, 8H)
        rec0 = fused[:, :H4]          # layer-0 recurrence for step t+1
        g1 = fused[:, H4:] + rec1 + b1

        # ---- layer 1, step t
        h1, c1 = gates_to_hc(g1, c1)

    # ---- FC head on the last top-layer hidden state --------------------------
    if out_is_scalar:
        # output_size == 1: N=1 would waste a systolic pass; VPU mul + reduce.
        out_ref[...] = jnp.sum(h1 * wfc, axis=-1, keepdims=True) + bfc
    else:
        # natural (H, out) MXU orientation (no transposed contraction)
        out_ref[...] = jnp.dot(h1, wfc, preferred_element_type=jnp.float32) + bfc


def _reorder_gate_cols(w):
    """Permute the 4H gate columns from PyTorch [i, f, g, o] to [i, f, o, g]."""
    H = w.shape[-1] // 4
    return jnp.concatenate([w[..., :2 * H], w[..., 3 * H:], w[..., 2 * H:3 * H]],
                           axis=-1)


def rnn_forecaster(x, params):
    """x: (batch, seq_len, input_size) float32 -> (batch, output_size)."""
    B, T, I = x.shape
    H = params["w_hh0"].shape[0]
    out_size = params["w_fc"].shape[1]

    # ---- one-time wrapper-side prep (trace-time XLA ops, off the hot path) --
    BT = 8                                        # one f32 sublane group per tile
    B_pad = max(BT, ((B + BT - 1) // BT) * BT)    # full sublane occupancy
    if B_pad != B:
        x = jnp.pad(x, ((0, B_pad - B), (0, 0), (0, 0)))
    x_tm = jnp.transpose(x, (1, 0, 2))            # time-major (T, B_pad, I)

    w_ih0 = _reorder_gate_cols(params["w_ih0"])   # (I, 4H)
    b0 = _reorder_gate_cols(params["b0"])         # (1, 4H)
    w_hh0 = _reorder_gate_cols(params["w_hh0"])   # (H, 4H)
    w_ih1 = _reorder_gate_cols(params["w_ih1"])   # (H, 4H)
    w_hh1 = _reorder_gate_cols(params["w_hh1"])   # (H, 4H)
    b1 = _reorder_gate_cols(params["b1"])         # (1, 4H)
    # Single fused weight: dot(h0_t, [W_hh0 | W_ih1]) gives layer-0 recurrent
    # gates for step t+1 and layer-1 input gates for step t in one MXU issue.
    w_fused = jnp.concatenate([w_hh0, w_ih1], axis=1)        # (H, 8H)

    out_is_scalar = (out_size == 1)
    w_fc = params["w_fc"].T if out_is_scalar else params["w_fc"]  # (1,H) or (H,out)
    b_fc = params["b_fc"]

    kernel = functools.partial(lstm_forecaster_kernel, out_is_scalar=out_is_scalar)

    resident = pl.BlockSpec(memory_space=pltpu.MemorySpace.VMEM)  # whole-array weights
    grid = (B_pad // BT,)

    out = pl.pallas_call(
        kernel,
        out_shape=jax.ShapeDtypeStruct((B_pad, out_size), jnp.float32),
        grid=grid,
        in_specs=[
            pl.BlockSpec((T, BT, I), lambda i: (0, i, 0)),   # batch-tiled x
            resident,   # w_ih0
            resident,   # b0
            resident,   # w_fused
            resident,   # w_hh1
            resident,   # b1
            resident,   # w_fc
            resident,   # b_fc
        ],
        out_specs=pl.BlockSpec((BT, out_size), lambda i: (i, 0)),
        compiler_params=pltpu.CompilerParams(
            dimension_semantics=("parallel",)),  # both TCs on v7x when grid > 1
    )(x_tm, w_ih0, b0, w_fused, w_hh1, b1, w_fc, b_fc)

    return out[:B]


def init_params(key, input_size, hidden_size, output_size):
    """Deterministic PyTorch-style uniform(-1/sqrt(H), 1/sqrt(H)) init."""
    H = hidden_size
    k_lstm = 1.0 / jnp.sqrt(jnp.float32(H))
    k_fc = 1.0 / jnp.sqrt(jnp.float32(H))
    keys = jax.random.split(key, 10)

    def u(k, shape, scale):
        return jax.random.uniform(k, shape, jnp.float32, -scale, scale)

    # Stored transposed relative to PyTorch: (in_features, 4H); PyTorch gate
    # order [i, f, g, o] (the wrapper reorders for the kernel).
    w_ih0 = u(keys[0], (input_size, 4 * H), k_lstm)
    w_hh0 = u(keys[1], (H, 4 * H), k_lstm)
    b0 = u(keys[2], (1, 4 * H), k_lstm) + u(keys[3], (1, 4 * H), k_lstm)  # b_ih + b_hh
    w_ih1 = u(keys[4], (H, 4 * H), k_lstm)
    w_hh1 = u(keys[5], (H, 4 * H), k_lstm)
    b1 = u(keys[6], (1, 4 * H), k_lstm) + u(keys[7], (1, 4 * H), k_lstm)
    w_fc = u(keys[8], (H, output_size), k_fc)
    b_fc = u(keys[9], (1, output_size), k_fc)

    return dict(w_ih0=w_ih0, w_hh0=w_hh0, b0=b0,
                w_ih1=w_ih1, w_hh1=w_hh1, b1=b1,
                w_fc=w_fc, b_fc=b_fc)


def _reference(x, params, hidden_size):
    """Pure-JAX reference (PyTorch gate order, no Pallas) for sanity checking."""
    B, T, _ = x.shape
    H = hidden_size
    h0 = c0 = h1 = c1 = jnp.zeros((B, H), jnp.float32)

    def gates_to_hc(g, c_prev):
        i = jax.nn.sigmoid(g[:, :H])
        f = jax.nn.sigmoid(g[:, H:2 * H])
        gg = jnp.tanh(g[:, 2 * H:3 * H])
        o = jax.nn.sigmoid(g[:, 3 * H:])
        c = f * c_prev + i * gg
        return o * jnp.tanh(c), c

    for t in range(T):
        xt = x[:, t, :]
        g0 = xt @ params["w_ih0"] + h0 @ params["w_hh0"] + params["b0"]
        h0, c0 = gates_to_hc(g0, c0)
        g1 = h0 @ params["w_ih1"] + h1 @ params["w_hh1"] + params["b1"]
        h1, c1 = gates_to_hc(g1, c1)
    return h1 @ params["w_fc"] + params["b_fc"]


if __name__ == "__main__":
    batch, seq_len, input_size = 2, 8, 4
    hidden_size, output_size = 32, 1

    key = jax.random.PRNGKey(0)
    k_x, k_p = jax.random.split(key)
    x = jax.random.normal(k_x, (batch, seq_len, input_size), jnp.float32)
    params = init_params(k_p, input_size, hidden_size, output_size)

    out = rnn_forecaster(x, params)
    out = jax.block_until_ready(out)

    ref = _reference(x, params, hidden_size)
    assert out.shape == (batch, output_size)
    assert jnp.allclose(out, ref, atol=1e-4, rtol=1e-4), (
        f"max abs diff {jnp.max(jnp.abs(out - ref))}")

    print("KERNEL_OK")
</pallas_src>

<mosaic_0001>
module attributes {stable_mosaic.version = 11 : i64} {
  func.func @lstm_forecaster_kernel(%arg0: i32, %arg1: memref<8x8x4xf32, #tpu.memory_space<vmem>>, %arg2: memref<4x128xf32, #tpu.memory_space<vmem>>, %arg3: memref<1x128xf32, #tpu.memory_space<vmem>>, %arg4: memref<32x256xf32, #tpu.memory_space<vmem>>, %arg5: memref<32x128xf32, #tpu.memory_space<vmem>>, %arg6: memref<1x128xf32, #tpu.memory_space<vmem>>, %arg7: memref<1x32xf32, #tpu.memory_space<vmem>>, %arg8: memref<1x1xf32, #tpu.memory_space<vmem>>, %arg9: memref<8x1xf32, #tpu.memory_space<vmem>>) attributes {dimension_semantics = [#tpu.dimension_semantics<parallel>], iteration_bounds = array<i64: 1>, scalar_prefetch = 0 : i64, scratch_operands = 0 : i64, tpu.core_type = #tpu.core_type<tc>, window_params = [{transform_indices = @transform_0, window_bounds = array<i64: 8, 8, 4>}, {pipeline_mode = #tpu.pipeline_mode<synchronous>, transform_indices = @transform_1, window_bounds = array<i64: 4, 128>}, {pipeline_mode = #tpu.pipeline_mode<synchronous>, transform_indices = @transform_2, window_bounds = array<i64: 1, 128>}, {pipeline_mode = #tpu.pipeline_mode<synchronous>, transform_indices = @transform_3, window_bounds = array<i64: 32, 256>}, {pipeline_mode = #tpu.pipeline_mode<synchronous>, transform_indices = @transform_4, window_bounds = array<i64: 32, 128>}, {pipeline_mode = #tpu.pipeline_mode<synchronous>, transform_indices = @transform_5, window_bounds = array<i64: 1, 128>}, {pipeline_mode = #tpu.pipeline_mode<synchronous>, transform_indices = @transform_6, window_bounds = array<i64: 1, 32>}, {pipeline_mode = #tpu.pipeline_mode<synchronous>, transform_indices = @transform_7, window_bounds = array<i64: 1, 1>}, {transform_indices = @transform_8, window_bounds = array<i64: 8, 1>}]} {
    %c0 = arith.constant 0 : index
    %c0_0 = arith.constant 0 : index
    %0 = vector.load %arg2[%c0, %c0_0] : memref<4x128xf32, #tpu.memory_space<vmem>>, vector<4x128xf32>
    %c0_1 = arith.constant 0 : index
    %c0_2 = arith.constant 0 : index
    %1 = vector.load %arg3[%c0_1, %c0_2] : memref<1x128xf32, #tpu.memory_space<vmem>>, vector<1x128xf32>
    %c0_3 = arith.constant 0 : index
    %c0_4 = arith.constant 0 : index
    %2 = vector.load %arg4[%c0_3, %c0_4] : memref<32x256xf32, #tpu.memory_space<vmem>>, vector<32x256xf32>
    %c0_5 = arith.constant 0 : index
    %c0_6 = arith.constant 0 : index
    %3 = vector.load %arg5[%c0_5, %c0_6] : memref<32x128xf32, #tpu.memory_space<vmem>>, vector<32x128xf32>
    %c0_7 = arith.constant 0 : index
    %c0_8 = arith.constant 0 : index
    %4 = vector.load %arg6[%c0_7, %c0_8] : memref<1x128xf32, #tpu.memory_space<vmem>>, vector<1x128xf32>
    %5 = vector.shape_cast %4 : vector<1x128xf32> to vector<1x128xf32>
    %6 = vector.broadcast %5 : vector<1x128xf32> to vector<8x128xf32>
    %c0_9 = arith.constant 0 : index
    %c0_10 = arith.constant 0 : index
    %7 = vector.load %arg7[%c0_9, %c0_10] : memref<1x32xf32, #tpu.memory_space<vmem>>, vector<1x32xf32>
    %c0_11 = arith.constant 0 : index
    %c0_12 = arith.constant 0 : index
    %8 = vector.load %arg8[%c0_11, %c0_12] : memref<1x1xf32, #tpu.memory_space<vmem>>, vector<1x1xf32>
    %c0_13 = arith.constant 0 : index
    %c0_14 = arith.constant 0 : index
    %c0_15 = arith.constant 0 : index
    %9 = vector.load %arg1[%c0_13, %c0_14, %c0_15] : memref<8x8x4xf32, #tpu.memory_space<vmem>>, vector<8x8x4xf32>
    %10 = vector.shape_cast %9 : vector<8x8x4xf32> to vector<64x4xf32>
    %cst = arith.constant dense<0.000000e+00> : vector<64x128xf32>
    %11 = tpu.matmul %10, %0, %cst {dimension_numbers = #tpu.dot_dimension_numbers<[1], [0], [0], [1], [0, 0, 1, 1], [], []>} : vector<64x4xf32>, vector<4x128xf32>, vector<64x128xf32> -> vector<64x128xf32>
    %12 = vector.broadcast %1 : vector<1x128xf32> to vector<64x128xf32>
    %13 = arith.addf %11, %12 : vector<64x128xf32>
    %cst_16 = arith.constant 0.000000e+00 : f32
    %14 = vector.broadcast %cst_16 : f32 to vector<8x32xf32>
    %cst_17 = arith.constant 0.000000e+00 : f32
    %15 = vector.broadcast %cst_17 : f32 to vector<8x128xf32>
    %16 = vector.extract_strided_slice %13 {offsets = [0, 0], sizes = [8, 128], strides = [1, 1]} : vector<64x128xf32> to vector<8x128xf32>
    %17 = vector.extract_strided_slice %16 {offsets = [0, 0], sizes = [8, 96], strides = [1, 1]} : vector<8x128xf32> to vector<8x96xf32>
    %18 = arith.negf %17 : vector<8x96xf32>
    %19 = math.exp %18 : vector<8x96xf32>
    %cst_18 = arith.constant 1.000000e+00 : f32
    %20 = vector.broadcast %cst_18 : f32 to vector<8x96xf32>
    %21 = arith.addf %20, %19 : vector<8x96xf32>
    %22 = arith.divf %20, %21 : vector<8x96xf32>
    %23 = vector.extract_strided_slice %16 {offsets = [0, 96], sizes = [8, 32], strides = [1, 1]} : vector<8x128xf32> to vector<8x32xf32>
    %24 = math.tanh %23 : vector<8x32xf32>
    %25 = vector.extract_strided_slice %22 {offsets = [0, 0], sizes = [8, 32], strides = [1, 1]} : vector<8x96xf32> to vector<8x32xf32>
    %26 = vector.extract_strided_slice %22 {offsets = [0, 32], sizes = [8, 32], strides = [1, 1]} : vector<8x96xf32> to vector<8x32xf32>
    %27 = vector.extract_strided_slice %22 {offsets = [0, 64], sizes = [8, 32], strides = [1, 1]} : vector<8x96xf32> to vector<8x32xf32>
    %28 = arith.mulf %26, %14 : vector<8x32xf32>
    %29 = arith.mulf %25, %24 : vector<8x32xf32>
    %30 = arith.addf %28, %29 : vector<8x32xf32>
    %31 = math.tanh %30 : vector<8x32xf32>
    %32 = arith.mulf %27, %31 : vector<8x32xf32>
    %cst_19 = arith.constant dense<0.000000e+00> : vector<8x256xf32>
    %33 = tpu.matmul %32, %2, %cst_19 {dimension_numbers = #tpu.dot_dimension_numbers<[1], [0], [0], [1], [0, 0, 1, 1], [], []>} : vector<8x32xf32>, vector<32x256xf32>, vector<8x256xf32> -> vector<8x256xf32>
    %34 = vector.extract_strided_slice %33 {offsets = [0, 0], sizes = [8, 128], strides = [1, 1]} : vector<8x256xf32> to vector<8x128xf32>
    %35 = vector.extract_strided_slice %33 {offsets = [0, 128], sizes = [8, 128], strides = [1, 1]} : vector<8x256xf32> to vector<8x128xf32>
    %36 = arith.addf %35, %15 : vector<8x128xf32>
    %37 = arith.addf %36, %6 : vector<8x128xf32>
    %38 = vector.extract_strided_slice %37 {offsets = [0, 0], sizes = [8, 96], strides = [1, 1]} : vector<8x128xf32> to vector<8x96xf32>
    %39 = arith.negf %38 : vector<8x96xf32>
    %40 = math.exp %39 : vector<8x96xf32>
    %cst_20 = arith.constant 1.000000e+00 : f32
    %41 = vector.broadcast %cst_20 : f32 to vector<8x96xf32>
    %42 = arith.addf %41, %40 : vector<8x96xf32>
    %43 = arith.divf %41, %42 : vector<8x96xf32>
    %44 = vector.extract_strided_slice %37 {offsets = [0, 96], sizes = [8, 32], strides = [1, 1]} : vector<8x128xf32> to vector<8x32xf32>
    %45 = math.tanh %44 : vector<8x32xf32>
    %46 = vector.extract_strided_slice %43 {offsets = [0, 0], sizes = [8, 32], strides = [1, 1]} : vector<8x96xf32> to vector<8x32xf32>
    %47 = vector.extract_strided_slice %43 {offsets = [0, 32], sizes = [8, 32], strides = [1, 1]} : vector<8x96xf32> to vector<8x32xf32>
    %48 = vector.extract_strided_slice %43 {offsets = [0, 64], sizes = [8, 32], strides = [1, 1]} : vector<8x96xf32> to vector<8x32xf32>
    %49 = arith.mulf %47, %14 : vector<8x32xf32>
    %50 = arith.mulf %46, %45 : vector<8x32xf32>
    %51 = arith.addf %49, %50 : vector<8x32xf32>
    %52 = math.tanh %51 : vector<8x32xf32>
    %53 = arith.mulf %48, %52 : vector<8x32xf32>
    %cst_21 = arith.constant dense<0.000000e+00> : vector<8x128xf32>
    %54 = tpu.matmul %53, %3, %cst_21 {dimension_numbers = #tpu.dot_dimension_numbers<[1], [0], [0], [1], [0, 0, 1, 1], [], []>} : vector<8x32xf32>, vector<32x128xf32>, vector<8x128xf32> -> vector<8x128xf32>
    %55 = vector.extract_strided_slice %13 {offsets = [8, 0], sizes = [8, 128], strides = [1, 1]} : vector<64x128xf32> to vector<8x128xf32>
    %56 = arith.addf %55, %34 : vector<8x128xf32>
    %57 = vector.extract_strided_slice %56 {offsets = [0, 0], sizes = [8, 96], strides = [1, 1]} : vector<8x128xf32> to vector<8x96xf32>
    %58 = arith.negf %57 : vector<8x96xf32>
    %59 = math.exp %58 : vector<8x96xf32>
    %cst_22 = arith.constant 1.000000e+00 : f32
    %60 = vector.broadcast %cst_22 : f32 to vector<8x96xf32>
    %61 = arith.addf %60, %59 : vector<8x96xf32>
    %62 = arith.divf %60, %61 : vector<8x96xf32>
    %63 = vector.extract_strided_slice %56 {offsets = [0, 96], sizes = [8, 32], strides = [1, 1]} : vector<8x128xf32> to vector<8x32xf32>
    %64 = math.tanh %63 : vector<8x32xf32>
    %65 = vector.extract_strided_slice %62 {offsets = [0, 0], sizes = [8, 32], strides = [1, 1]} : vector<8x96xf32> to vector<8x32xf32>
    %66 = vector.extract_strided_slice %62 {offsets = [0, 32], sizes = [8, 32], strides = [1, 1]} : vector<8x96xf32> to vector<8x32xf32>
    %67 = vector.extract_strided_slice %62 {offsets = [0, 64], sizes = [8, 32], strides = [1, 1]} : vector<8x96xf32> to vector<8x32xf32>
    %68 = arith.mulf %66, %30 : vector<8x32xf32>
    %69 = arith.mulf %65, %64 : vector<8x32xf32>
    %70 = arith.addf %68, %69 : vector<8x32xf32>
    %71 = math.tanh %70 : vector<8x32xf32>
    %72 = arith.mulf %67, %71 : vector<8x32xf32>
    %cst_23 = arith.constant dense<0.000000e+00> : vector<8x256xf32>
    %73 = tpu.matmul %72, %2, %cst_23 {dimension_numbers = #tpu.dot_dimension_numbers<[1], [0], [0], [1], [0, 0, 1, 1], [], []>} : vector<8x32xf32>, vector<32x256xf32>, vector<8x256xf32> -> vector<8x256xf32>
    %74 = vector.extract_strided_slice %73 {offsets = [0, 0], sizes = [8, 128], strides = [1, 1]} : vector<8x256xf32> to vector<8x128xf32>
    %75 = vector.extract_strided_slice %73 {offsets = [0, 128], sizes = [8, 128], strides = [1, 1]} : vector<8x256xf32> to vector<8x128xf32>
    %76 = arith.addf %75, %54 : vector<8x128xf32>
    %77 = arith.addf %76, %6 : vector<8x128xf32>
    %78 = vector.extract_strided_slice %77 {offsets = [0, 0], sizes = [8, 96], strides = [1, 1]} : vector<8x128xf32> to vector<8x96xf32>
    %79 = arith.negf %78 : vector<8x96xf32>
    %80 = math.exp %79 : vector<8x96xf32>
    %cst_24 = arith.constant 1.000000e+00 : f32
    %81 = vector.broadcast %cst_24 : f32 to vector<8x96xf32>
    %82 = arith.addf %81, %80 : vector<8x96xf32>
    %83 = arith.divf %81, %82 : vector<8x96xf32>
    %84 = vector.extract_strided_slice %77 {offsets = [0, 96], sizes = [8, 32], strides = [1, 1]} : vector<8x128xf32> to vector<8x32xf32>
    %85 = math.tanh %84 : vector<8x32xf32>
    %86 = vector.extract_strided_slice %83 {offsets = [0, 0], sizes = [8, 32], strides = [1, 1]} : vector<8x96xf32> to vector<8x32xf32>
    %87 = vector.extract_strided_slice %83 {offsets = [0, 32], sizes = [8, 32], strides = [1, 1]} : vector<8x96xf32> to vector<8x32xf32>
    %88 = vector.extract_strided_slice %83 {offsets = [0, 64], sizes = [8, 32], strides = [1, 1]} : vector<8x96xf32> to vector<8x32xf32>
    %89 = arith.mulf %87, %51 : vector<8x32xf32>
    %90 = arith.mulf %86, %85 : vector<8x32xf32>
    %91 = arith.addf %89, %90 : vector<8x32xf32>
    %92 = math.tanh %91 : vector<8x32xf32>
    %93 = arith.mulf %88, %92 : vector<8x32xf32>
    %cst_25 = arith.constant dense<0.000000e+00> : vector<8x128xf32>
    %94 = tpu.matmul %93, %3, %cst_25 {dimension_numbers = #tpu.dot_dimension_numbers<[1], [0], [0], [1], [0, 0, 1, 1], [], []>} : vector<8x32xf32>, vector<32x128xf32>, vector<8x128xf32> -> vector<8x128xf32>
    %95 = vector.extract_strided_slice %13 {offsets = [16, 0], sizes = [8, 128], strides = [1, 1]} : vector<64x128xf32> to vector<8x128xf32>
    %96 = arith.addf %95, %74 : vector<8x128xf32>
    %97 = vector.extract_strided_slice %96 {offsets = [0, 0], sizes = [8, 96], strides = [1, 1]} : vector<8x128xf32> to vector<8x96xf32>
    %98 = arith.negf %97 : vector<8x96xf32>
    %99 = math.exp %98 : vector<8x96xf32>
    %cst_26 = arith.constant 1.000000e+00 : f32
    %100 = vector.broadcast %cst_26 : f32 to vector<8x96xf32>
    %101 = arith.addf %100, %99 : vector<8x96xf32>
    %102 = arith.divf %100, %101 : vector<8x96xf32>
    %103 = vector.extract_strided_slice %96 {offsets = [0, 96], sizes = [8, 32], strides = [1, 1]} : vector<8x128xf32> to vector<8x32xf32>
    %104 = math.tanh %103 : vector<8x32xf32>
    %105 = vector.extract_strided_slice %102 {offsets = [0, 0], sizes = [8, 32], strides = [1, 1]} : vector<8x96xf32> to vector<8x32xf32>
    %106 = vector.extract_strided_slice %102 {offsets = [0, 32], sizes = [8, 32], strides = [1, 1]} : vector<8x96xf32> to vector<8x32xf32>
    %107 = vector.extract_strided_slice %102 {offsets = [0, 64], sizes = [8, 32], strides = [1, 1]} : vector<8x96xf32> to vector<8x32xf32>
    %108 = arith.mulf %106, %70 : vector<8x32xf32>
    %109 = arith.mulf %105, %104 : vector<8x32xf32>
    %110 = arith.addf %108, %109 : vector<8x32xf32>
    %111 = math.tanh %110 : vector<8x32xf32>
    %112 = arith.mulf %107, %111 : vector<8x32xf32>
    %cst_27 = arith.constant dense<0.000000e+00> : vector<8x256xf32>
    %113 = tpu.matmul %112, %2, %cst_27 {dimension_numbers = #tpu.dot_dimension_numbers<[1], [0], [0], [1], [0, 0, 1, 1], [], []>} : vector<8x32xf32>, vector<32x256xf32>, vector<8x256xf32> -> vector<8x256xf32>
    %114 = vector.extract_strided_slice %113 {offsets = [0, 0], sizes = [8, 128], strides = [1, 1]} : vector<8x256xf32> to vector<8x128xf32>
    %115 = vector.extract_strided_slice %113 {offsets = [0, 128], sizes = [8, 128], strides = [1, 1]} : vector<8x256xf32> to vector<8x128xf32>
    %116 = arith.addf %115, %94 : vector<8x128xf32>
    %117 = arith.addf %116, %6 : vector<8x128xf32>
    %118 = vector.extract_strided_slice %117 {offsets = [0, 0], sizes = [8, 96], strides = [1, 1]} : vector<8x128xf32> to vector<8x96xf32>
    %119 = arith.negf %118 : vector<8x96xf32>
    %120 = math.exp %119 : vector<8x96xf32>
    %cst_28 = arith.constant 1.000000e+00 : f32
    %121 = vector.broadcast %cst_28 : f32 to vector<8x96xf32>
    %122 = arith.addf %121, %120 : vector<8x96xf32>
    %123 = arith.divf %121, %122 : vector<8x96xf32>
    %124 = vector.extract_strided_slice %117 {offsets = [0, 96], sizes = [8, 32], strides = [1, 1]} : vector<8x128xf32> to vector<8x32xf32>
    %125 = math.tanh %124 : vector<8x32xf32>
    %126 = vector.extract_strided_slice %123 {offsets = [0, 0], sizes = [8, 32], strides = [1, 1]} : vector<8x96xf32> to vector<8x32xf32>
    %127 = vector.extract_strided_slice %123 {offsets = [0, 32], sizes = [8, 32], strides = [1, 1]} : vector<8x96xf32> to vector<8x32xf32>
    %128 = vector.extract_strided_slice %123 {offsets = [0, 64], sizes = [8, 32], strides = [1, 1]} : vector<8x96xf32> to vector<8x32xf32>
    %129 = arith.mulf %127, %91 : vector<8x32xf32>
    %130 = arith.mulf %126, %125 : vector<8x32xf32>
    %131 = arith.addf %129, %130 : vector<8x32xf32>
    %132 = math.tanh %131 : vector<8x32xf32>
    %133 = arith.mulf %128, %132 : vector<8x32xf32>
    %cst_29 = arith.constant dense<0.000000e+00> : vector<8x128xf32>
    %134 = tpu.matmul %133, %3, %cst_29 {dimension_numbers = #tpu.dot_dimension_numbers<[1], [0], [0], [1], [0, 0, 1, 1], [], []>} : vector<8x32xf32>, vector<32x128xf32>, vector<8x128xf32> -> vector<8x128xf32>
    %135 = vector.extract_strided_slice %13 {offsets = [24, 0], sizes = [8, 128], strides = [1, 1]} : vector<64x128xf32> to vector<8x128xf32>
    %136 = arith.addf %135, %114 : vector<8x128xf32>
    %137 = vector.extract_strided_slice %136 {offsets = [0, 0], sizes = [8, 96], strides = [1, 1]} : vector<8x128xf32> to vector<8x96xf32>
    %138 = arith.negf %137 : vector<8x96xf32>
    %139 = math.exp %138 : vector<8x96xf32>
    %cst_30 = arith.constant 1.000000e+00 : f32
    %140 = vector.broadcast %cst_30 : f32 to vector<8x96xf32>
    %141 = arith.addf %140, %139 : vector<8x96xf32>
    %142 = arith.divf %140, %141 : vector<8x96xf32>
    %143 = vector.extract_strided_slice %136 {offsets = [0, 96], sizes = [8, 32], strides = [1, 1]} : vector<8x128xf32> to vector<8x32xf32>
    %144 = math.tanh %143 : vector<8x32xf32>
    %145 = vector.extract_strided_slice %142 {offsets = [0, 0], sizes = [8, 32], strides = [1, 1]} : vector<8x96xf32> to vector<8x32xf32>
    %146 = vector.extract_strided_slice %142 {offsets = [0, 32], sizes = [8, 32], strides = [1, 1]} : vector<8x96xf32> to vector<8x32xf32>
    %147 = vector.extract_strided_slice %142 {offsets = [0, 64], sizes = [8, 32], strides = [1, 1]} : vector<8x96xf32> to vector<8x32xf32>
    %148 = arith.mulf %146, %110 : vector<8x32xf32>
    %149 = arith.mulf %145, %144 : vector<8x32xf32>
    %150 = arith.addf %148, %149 : vector<8x32xf32>
    %151 = math.tanh %150 : vector<8x32xf32>
    %152 = arith.mulf %147, %151 : vector<8x32xf32>
    %cst_31 = arith.constant dense<0.000000e+00> : vector<8x256xf32>
    %153 = tpu.matmul %152, %2, %cst_31 {dimension_numbers = #tpu.dot_dimension_numbers<[1], [0], [0], [1], [0, 0, 1, 1], [], []>} : vector<8x32xf32>, vector<32x256xf32>, vector<8x256xf32> -> vector<8x256xf32>
    %154 = vector.extract_strided_slice %153 {offsets = [0, 0], sizes = [8, 128], strides = [1, 1]} : vector<8x256xf32> to vector<8x128xf32>
    %155 = vector.extract_strided_slice %153 {offsets = [0, 128], sizes = [8, 128], strides = [1, 1]} : vector<8x256xf32> to vector<8x128xf32>
    %156 = arith.addf %155, %134 : vector<8x128xf32>
    %157 = arith.addf %156, %6 : vector<8x128xf32>
    %158 = vector.extract_strided_slice %157 {offsets = [0, 0], sizes = [8, 96], strides = [1, 1]} : vector<8x128xf32> to vector<8x96xf32>
    %159 = arith.negf %158 : vector<8x96xf32>
    %160 = math.exp %159 : vector<8x96xf32>
    %cst_32 = arith.constant 1.000000e+00 : f32
    %161 = vector.broadcast %cst_32 : f32 to vector<8x96xf32>
    %162 = arith.addf %161, %160 : vector<8x96xf32>
    %163 = arith.divf %161, %162 : vector<8x96xf32>
    %164 = vector.extract_strided_slice %157 {offsets = [0, 96], sizes = [8, 32], strides = [1, 1]} : vector<8x128xf32> to vector<8x32xf32>
    %165 = math.tanh %164 : vector<8x32xf32>
    %166 = vector.extract_strided_slice %163 {offsets = [0, 0], sizes = [8, 32], strides = [1, 1]} : vector<8x96xf32> to vector<8x32xf32>
    %167 = vector.extract_strided_slice %163 {offsets = [0, 32], sizes = [8, 32], strides = [1, 1]} : vector<8x96xf32> to vector<8x32xf32>
    %168 = vector.extract_strided_slice %163 {offsets = [0, 64], sizes = [8, 32], strides = [1, 1]} : vector<8x96xf32> to vector<8x32xf32>
    %169 = arith.mulf %167, %131 : vector<8x32xf32>
    %170 = arith.mulf %166, %165 : vector<8x32xf32>
    %171 = arith.addf %169, %170 : vector<8x32xf32>
    %172 = math.tanh %171 : vector<8x32xf32>
    %173 = arith.mulf %168, %172 : vector<8x32xf32>
    %cst_33 = arith.constant dense<0.000000e+00> : vector<8x128xf32>
    %174 = tpu.matmul %173, %3, %cst_33 {dimension_numbers = #tpu.dot_dimension_numbers<[1], [0], [0], [1], [0, 0, 1, 1], [], []>} : vector<8x32xf32>, vector<32x128xf32>, vector<8x128xf32> -> vector<8x128xf32>
    %175 = vector.extract_strided_slice %13 {offsets = [32, 0], sizes = [8, 128], strides = [1, 1]} : vector<64x128xf32> to vector<8x128xf32>
    %176 = arith.addf %175, %154 : vector<8x128xf32>
    %177 = vector.extract_strided_slice %176 {offsets = [0, 0], sizes = [8, 96], strides = [1, 1]} : vector<8x128xf32> to vector<8x96xf32>
    %178 = arith.negf %177 : vector<8x96xf32>
    %179 = math.exp %178 : vector<8x96xf32>
    %cst_34 = arith.constant 1.000000e+00 : f32
    %180 = vector.broadcast %cst_34 : f32 to vector<8x96xf32>
    %181 = arith.addf %180, %179 : vector<8x96xf32>
    %182 = arith.divf %180, %181 : vector<8x96xf32>
    %183 = vector.extract_strided_slice %176 {offsets = [0, 96], sizes = [8, 32], strides = [1, 1]} : vector<8x128xf32> to vector<8x32xf32>
    %184 = math.tanh %183 : vector<8x32xf32>
    %185 = vector.extract_strided_slice %182 {offsets = [0, 0], sizes = [8, 32], strides = [1, 1]} : vector<8x96xf32> to vector<8x32xf32>
    %186 = vector.extract_strided_slice %182 {offsets = [0, 32], sizes = [8, 32], strides = [1, 1]} : vector<8x96xf32> to vector<8x32xf32>
    %187 = vector.extract_strided_slice %182 {offsets = [0, 64], sizes = [8, 32], strides = [1, 1]} : vector<8x96xf32> to vector<8x32xf32>
    %188 = arith.mulf %186, %150 : vector<8x32xf32>
    %189 = arith.mulf %185, %184 : vector<8x32xf32>
    %190 = arith.addf %188, %189 : vector<8x32xf32>
    %191 = math.tanh %190 : vector<8x32xf32>
    %192 = arith.mulf %187, %191 : vector<8x32xf32>
    %cst_35 = arith.constant dense<0.000000e+00> : vector<8x256xf32>
    %193 = tpu.matmul %192, %2, %cst_35 {dimension_numbers = #tpu.dot_dimension_numbers<[1], [0], [0], [1], [0, 0, 1, 1], [], []>} : vector<8x32xf32>, vector<32x256xf32>, vector<8x256xf32> -> vector<8x256xf32>
    %194 = vector.extract_strided_slice %193 {offsets = [0, 0], sizes = [8, 128], strides = [1, 1]} : vector<8x256xf32> to vector<8x128xf32>
    %195 = vector.extract_strided_slice %193 {offsets = [0, 128], sizes = [8, 128], strides = [1, 1]} : vector<8x256xf32> to vector<8x128xf32>
    %196 = arith.addf %195, %174 : vector<8x128xf32>
    %197 = arith.addf %196, %6 : vector<8x128xf32>
    %198 = vector.extract_strided_slice %197 {offsets = [0, 0], sizes = [8, 96], strides = [1, 1]} : vector<8x128xf32> to vector<8x96xf32>
    %199 = arith.negf %198 : vector<8x96xf32>
    %200 = math.exp %199 : vector<8x96xf32>
    %cst_36 = arith.constant 1.000000e+00 : f32
    %201 = vector.broadcast %cst_36 : f32 to vector<8x96xf32>
    %202 = arith.addf %201, %200 : vector<8x96xf32>
    %203 = arith.divf %201, %202 : vector<8x96xf32>
    %204 = vector.extract_strided_slice %197 {offsets = [0, 96], sizes = [8, 32], strides = [1, 1]} : vector<8x128xf32> to vector<8x32xf32>
    %205 = math.tanh %204 : vector<8x32xf32>
    %206 = vector.extract_strided_slice %203 {offsets = [0, 0], sizes = [8, 32], strides = [1, 1]} : vector<8x96xf32> to vector<8x32xf32>
    %207 = vector.extract_strided_slice %203 {offsets = [0, 32], sizes = [8, 32], strides = [1, 1]} : vector<8x96xf32> to vector<8x32xf32>
    %208 = vector.extract_strided_slice %203 {offsets = [0, 64], sizes = [8, 32], strides = [1, 1]} : vector<8x96xf32> to vector<8x32xf32>
    %209 = arith.mulf %207, %171 : vector<8x32xf32>
    %210 = arith.mulf %206, %205 : vector<8x32xf32>
    %211 = arith.addf %209, %210 : vector<8x32xf32>
    %212 = math.tanh %211 : vector<8x32xf32>
    %213 = arith.mulf %208, %212 : vector<8x32xf32>
    %cst_37 = arith.constant dense<0.000000e+00> : vector<8x128xf32>
    %214 = tpu.matmul %213, %3, %cst_37 {dimension_numbers = #tpu.dot_dimension_numbers<[1], [0], [0], [1], [0, 0, 1, 1], [], []>} : vector<8x32xf32>, vector<32x128xf32>, vector<8x128xf32> -> vector<8x128xf32>
    %215 = vector.extract_strided_slice %13 {offsets = [40, 0], sizes = [8, 128], strides = [1, 1]} : vector<64x128xf32> to vector<8x128xf32>
    %216 = arith.addf %215, %194 : vector<8x128xf32>
    %217 = vector.extract_strided_slice %216 {offsets = [0, 0], sizes = [8, 96], strides = [1, 1]} : vector<8x128xf32> to vector<8x96xf32>
    %218 = arith.negf %217 : vector<8x96xf32>
    %219 = math.exp %218 : vector<8x96xf32>
    %cst_38 = arith.constant 1.000000e+00 : f32
    %220 = vector.broadcast %cst_38 : f32 to vector<8x96xf32>
    %221 = arith.addf %220, %219 : vector<8x96xf32>
    %222 = arith.divf %220, %221 : vector<8x96xf32>
    %223 = vector.extract_strided_slice %216 {offsets = [0, 96], sizes = [8, 32], strides = [1, 1]} : vector<8x128xf32> to vector<8x32xf32>
    %224 = math.tanh %223 : vector<8x32xf32>
    %225 = vector.extract_strided_slice %222 {offsets = [0, 0], sizes = [8, 32], strides = [1, 1]} : vector<8x96xf32> to vector<8x32xf32>
    %226 = vector.extract_strided_slice %222 {offsets = [0, 32], sizes = [8, 32], strides = [1, 1]} : vector<8x96xf32> to vector<8x32xf32>
    %227 = vector.extract_strided_slice %222 {offsets = [0, 64], sizes = [8, 32], strides = [1, 1]} : vector<8x96xf32> to vector<8x32xf32>
    %228 = arith.mulf %226, %190 : vector<8x32xf32>
    %229 = arith.mulf %225, %224 : vector<8x32xf32>
    %230 = arith.addf %228, %229 : vector<8x32xf32>
    %231 = math.tanh %230 : vector<8x32xf32>
    %232 = arith.mulf %227, %231 : vector<8x32xf32>
    %cst_39 = arith.constant dense<0.000000e+00> : vector<8x256xf32>
    %233 = tpu.matmul %232, %2, %cst_39 {dimension_numbers = #tpu.dot_dimension_numbers<[1], [0], [0], [1], [0, 0, 1, 1], [], []>} : vector<8x32xf32>, vector<32x256xf32>, vector<8x256xf32> -> vector<8x256xf32>
    %234 = vector.extract_strided_slice %233 {offsets = [0, 0], sizes = [8, 128], strides = [1, 1]} : vector<8x256xf32> to vector<8x128xf32>
    %235 = vector.extract_strided_slice %233 {offsets = [0, 128], sizes = [8, 128], strides = [1, 1]} : vector<8x256xf32> to vector<8x128xf32>
    %236 = arith.addf %235, %214 : vector<8x128xf32>
    %237 = arith.addf %236, %6 : vector<8x128xf32>
    %238 = vector.extract_strided_slice %237 {offsets = [0, 0], sizes = [8, 96], strides = [1, 1]} : vector<8x128xf32> to vector<8x96xf32>
    %239 = arith.negf %238 : vector<8x96xf32>
    %240 = math.exp %239 : vector<8x96xf32>
    %cst_40 = arith.constant 1.000000e+00 : f32
    %241 = vector.broadcast %cst_40 : f32 to vector<8x96xf32>
    %242 = arith.addf %241, %240 : vector<8x96xf32>
    %243 = arith.divf %241, %242 : vector<8x96xf32>
    %244 = vector.extract_strided_slice %237 {offsets = [0, 96], sizes = [8, 32], strides = [1, 1]} : vector<8x128xf32> to vector<8x32xf32>
    %245 = math.tanh %244 : vector<8x32xf32>
    %246 = vector.extract_strided_slice %243 {offsets = [0, 0], sizes = [8, 32], strides = [1, 1]} : vector<8x96xf32> to vector<8x32xf32>
    %247 = vector.extract_strided_slice %243 {offsets = [0, 32], sizes = [8, 32], strides = [1, 1]} : vector<8x96xf32> to vector<8x32xf32>
    %248 = vector.extract_strided_slice %243 {offsets = [0, 64], sizes = [8, 32], strides = [1, 1]} : vector<8x96xf32> to vector<8x32xf32>
    %249 = arith.mulf %247, %211 : vector<8x32xf32>
    %250 = arith.mulf %246, %245 : vector<8x32xf32>
    %251 = arith.addf %249, %250 : vector<8x32xf32>
    %252 = math.tanh %251 : vector<8x32xf32>
    %253 = arith.mulf %248, %252 : vector<8x32xf32>
    %cst_41 = arith.constant dense<0.000000e+00> : vector<8x128xf32>
    %254 = tpu.matmul %253, %3, %cst_41 {dimension_numbers = #tpu.dot_dimension_numbers<[1], [0], [0], [1], [0, 0, 1, 1], [], []>} : vector<8x32xf32>, vector<32x128xf32>, vector<8x128xf32> -> vector<8x128xf32>
    %255 = vector.extract_strided_slice %13 {offsets = [48, 0], sizes = [8, 128], strides = [1, 1]} : vector<64x128xf32> to vector<8x128xf32>
    %256 = arith.addf %255, %234 : vector<8x128xf32>
    %257 = vector.extract_strided_slice %256 {offsets = [0, 0], sizes = [8, 96], strides = [1, 1]} : vector<8x128xf32> to vector<8x96xf32>
    %258 = arith.negf %257 : vector<8x96xf32>
    %259 = math.exp %258 : vector<8x96xf32>
    %cst_42 = arith.constant 1.000000e+00 : f32
    %260 = vector.broadcast %cst_42 : f32 to vector<8x96xf32>
    %261 = arith.addf %260, %259 : vector<8x96xf32>
    %262 = arith.divf %260, %261 : vector<8x96xf32>
    %263 = vector.extract_strided_slice %256 {offsets = [0, 96], sizes = [8, 32], strides = [1, 1]} : vector<8x128xf32> to vector<8x32xf32>
    %264 = math.tanh %263 : vector<8x32xf32>
    %265 = vector.extract_strided_slice %262 {offsets = [0, 0], sizes = [8, 32], strides = [1, 1]} : vector<8x96xf32> to vector<8x32xf32>
    %266 = vector.extract_strided_slice %262 {offsets = [0, 32], sizes = [8, 32], strides = [1, 1]} : vector<8x96xf32> to vector<8x32xf32>
    %267 = vector.extract_strided_slice %262 {offsets = [0, 64], sizes = [8, 32], strides = [1, 1]} : vector<8x96xf32> to vector<8x32xf32>
    %268 = arith.mulf %266, %230 : vector<8x32xf32>
    %269 = arith.mulf %265, %264 : vector<8x32xf32>
    %270 = arith.addf %268, %269 : vector<8x32xf32>
    %271 = math.tanh %270 : vector<8x32xf32>
    %272 = arith.mulf %267, %271 : vector<8x32xf32>
    %cst_43 = arith.constant dense<0.000000e+00> : vector<8x256xf32>
    %273 = tpu.matmul %272, %2, %cst_43 {dimension_numbers = #tpu.dot_dimension_numbers<[1], [0], [0], [1], [0, 0, 1, 1], [], []>} : vector<8x32xf32>, vector<32x256xf32>, vector<8x256xf32> -> vector<8x256xf32>
    %274 = vector.extract_strided_slice %273 {offsets = [0, 0], sizes = [8, 128], strides = [1, 1]} : vector<8x256xf32> to vector<8x128xf32>
    %275 = vector.extract_strided_slice %273 {offsets = [0, 128], sizes = [8, 128], strides = [1, 1]} : vector<8x256xf32> to vector<8x128xf32>
    %276 = arith.addf %275, %254 : vector<8x128xf32>
    %277 = arith.addf %276, %6 : vector<8x128xf32>
    %278 = vector.extract_strided_slice %277 {offsets = [0, 0], sizes = [8, 96], strides = [1, 1]} : vector<8x128xf32> to vector<8x96xf32>
    %279 = arith.negf %278 : vector<8x96xf32>
    %280 = math.exp %279 : vector<8x96xf32>
    %cst_44 = arith.constant 1.000000e+00 : f32
    %281 = vector.broadcast %cst_44 : f32 to vector<8x96xf32>
    %282 = arith.addf %281, %280 : vector<8x96xf32>
    %283 = arith.divf %281, %282 : vector<8x96xf32>
    %284 = vector.extract_strided_slice %277 {offsets = [0, 96], sizes = [8, 32], strides = [1, 1]} : vector<8x128xf32> to vector<8x32xf32>
    %285 = math.tanh %284 : vector<8x32xf32>
    %286 = vector.extract_strided_slice %283 {offsets = [0, 0], sizes = [8, 32], strides = [1, 1]} : vector<8x96xf32> to vector<8x32xf32>
    %287 = vector.extract_strided_slice %283 {offsets = [0, 32], sizes = [8, 32], strides = [1, 1]} : vector<8x96xf32> to vector<8x32xf32>
    %288 = vector.extract_strided_slice %283 {offsets = [0, 64], sizes = [8, 32], strides = [1, 1]} : vector<8x96xf32> to vector<8x32xf32>
    %289 = arith.mulf %287, %251 : vector<8x32xf32>
    %290 = arith.mulf %286, %285 : vector<8x32xf32>
    %291 = arith.addf %289, %290 : vector<8x32xf32>
    %292 = math.tanh %291 : vector<8x32xf32>
    %293 = arith.mulf %288, %292 : vector<8x32xf32>
    %cst_45 = arith.constant dense<0.000000e+00> : vector<8x128xf32>
    %294 = tpu.matmul %293, %3, %cst_45 {dimension_numbers = #tpu.dot_dimension_numbers<[1], [0], [0], [1], [0, 0, 1, 1], [], []>} : vector<8x32xf32>, vector<32x128xf32>, vector<8x128xf32> -> vector<8x128xf32>
    %295 = vector.extract_strided_slice %13 {offsets = [56, 0], sizes = [8, 128], strides = [1, 1]} : vector<64x128xf32> to vector<8x128xf32>
    %296 = arith.addf %295, %274 : vector<8x128xf32>
    %297 = vector.extract_strided_slice %296 {offsets = [0, 0], sizes = [8, 96], strides = [1, 1]} : vector<8x128xf32> to vector<8x96xf32>
    %298 = arith.negf %297 : vector<8x96xf32>
    %299 = math.exp %298 : vector<8x96xf32>
    %cst_46 = arith.constant 1.000000e+00 : f32
    %300 = vector.broadcast %cst_46 : f32 to vector<8x96xf32>
    %301 = arith.addf %300, %299 : vector<8x96xf32>
    %302 = arith.divf %300, %301 : vector<8x96xf32>
    %303 = vector.extract_strided_slice %296 {offsets = [0, 96], sizes = [8, 32], strides = [1, 1]} : vector<8x128xf32> to vector<8x32xf32>
    %304 = math.tanh %303 : vector<8x32xf32>
    %305 = vector.extract_strided_slice %302 {offsets = [0, 0], sizes = [8, 32], strides = [1, 1]} : vector<8x96xf32> to vector<8x32xf32>
    %306 = vector.extract_strided_slice %302 {offsets = [0, 32], sizes = [8, 32], strides = [1, 1]} : vector<8x96xf32> to vector<8x32xf32>
    %307 = vector.extract_strided_slice %302 {offsets = [0, 64], sizes = [8, 32], strides = [1, 1]} : vector<8x96xf32> to vector<8x32xf32>
    %308 = arith.mulf %306, %270 : vector<8x32xf32>
    %309 = arith.mulf %305, %304 : vector<8x32xf32>
    %310 = arith.addf %308, %309 : vector<8x32xf32>
    %311 = math.tanh %310 : vector<8x32xf32>
    %312 = arith.mulf %307, %311 : vector<8x32xf32>
    %cst_47 = arith.constant dense<0.000000e+00> : vector<8x256xf32>
    %313 = tpu.matmul %312, %2, %cst_47 {dimension_numbers = #tpu.dot_dimension_numbers<[1], [0], [0], [1], [0, 0, 1, 1], [], []>} : vector<8x32xf32>, vector<32x256xf32>, vector<8x256xf32> -> vector<8x256xf32>
    %314 = vector.extract_strided_slice %313 {offsets = [0, 128], sizes = [8, 128], strides = [1, 1]} : vector<8x256xf32> to vector<8x128xf32>
    %315 = arith.addf %314, %294 : vector<8x128xf32>
    %316 = arith.addf %315, %6 : vector<8x128xf32>
    %317 = vector.extract_strided_slice %316 {offsets = [0, 0], sizes = [8, 96], strides = [1, 1]} : vector<8x128xf32> to vector<8x96xf32>
    %318 = arith.negf %317 : vector<8x96xf32>
    %319 = math.exp %318 : vector<8x96xf32>
    %cst_48 = arith.constant 1.000000e+00 : f32
    %320 = vector.broadcast %cst_48 : f32 to vector<8x96xf32>
    %321 = arith.addf %320, %319 : vector<8x96xf32>
    %322 = arith.divf %320, %321 : vector<8x96xf32>
    %323 = vector.extract_strided_slice %316 {offsets = [0, 96], sizes = [8, 32], strides = [1, 1]} : vector<8x128xf32> to vector<8x32xf32>
    %324 = math.tanh %323 : vector<8x32xf32>
    %325 = vector.extract_strided_slice %322 {offsets = [0, 0], sizes = [8, 32], strides = [1, 1]} : vector<8x96xf32> to vector<8x32xf32>
    %326 = vector.extract_strided_slice %322 {offsets = [0, 32], sizes = [8, 32], strides = [1, 1]} : vector<8x96xf32> to vector<8x32xf32>
    %327 = vector.extract_strided_slice %322 {offsets = [0, 64], sizes = [8, 32], strides = [1, 1]} : vector<8x96xf32> to vector<8x32xf32>
    %328 = arith.mulf %326, %291 : vector<8x32xf32>
    %329 = arith.mulf %325, %324 : vector<8x32xf32>
    %330 = arith.addf %328, %329 : vector<8x32xf32>
    %331 = math.tanh %330 : vector<8x32xf32>
    %332 = arith.mulf %327, %331 : vector<8x32xf32>
    %333 = vector.broadcast %7 : vector<1x32xf32> to vector<8x32xf32>
    %334 = arith.mulf %332, %333 : vector<8x32xf32>
    %cst_49 = arith.constant dense<0.000000e+00> : vector<8xf32>
    %335 = vector.multi_reduction <add>, %334, %cst_49 [1] : vector<8x32xf32> to vector<8xf32>
    %336 = vector.shape_cast %335 : vector<8xf32> to vector<8x1xf32>
    %337 = vector.broadcast %8 : vector<1x1xf32> to vector<8x1xf32>
    %338 = arith.addf %336, %337 : vector<8x1xf32>
    %c0_50 = arith.constant 0 : index
    %c0_51 = arith.constant 0 : index
    %339 = vector.load %arg9[%c0_50, %c0_51] : memref<8x1xf32, #tpu.memory_space<vmem>>, vector<8x1xf32>
    tpu.vector_store %arg9[%c0_50, %c0_51], %338 {strides = array<i32>} : memref<8x1xf32, #tpu.memory_space<vmem>>, vector<8x1xf32>,
    return
  }
  func.func @transform_0(%arg0: i32) -> (i32, i32, i32) {
    %c0_i32 = arith.constant 0 : i32
    %c0_i32_0 = arith.constant 0 : i32
    %c0_i32_1 = arith.constant 0 : i32
    return %c0_i32, %arg0, %c0_i32_0 : i32, i32, i32
  }
  func.func @transform_1(%arg0: i32) -> (i32, i32) {
    %c0_i32 = arith.constant 0 : i32
    %c0_i32_0 = arith.constant 0 : i32
    %c0_i32_1 = arith.constant 0 : i32
    return %c0_i32, %c0_i32_0 : i32, i32
  }
  func.func @transform_2(%arg0: i32) -> (i32, i32) {
    %c0_i32 = arith.constant 0 : i32
    %c0_i32_0 = arith.constant 0 : i32
    %c0_i32_1 = arith.constant 0 : i32
    return %c0_i32, %c0_i32_0 : i32, i32
  }
  func.func @transform_3(%arg0: i32) -> (i32, i32) {
    %c0_i32 = arith.constant 0 : i32
    %c0_i32_0 = arith.constant 0 : i32
    %c0_i32_1 = arith.constant 0 : i32
    return %c0_i32, %c0_i32_0 : i32, i32
  }
  func.func @transform_4(%arg0: i32) -> (i32, i32) {
    %c0_i32 = arith.constant 0 : i32
    %c0_i32_0 = arith.constant 0 : i32
    %c0_i32_1 = arith.constant 0 : i32
    return %c0_i32, %c0_i32_0 : i32, i32
  }
  func.func @transform_5(%arg0: i32) -> (i32, i32) {
    %c0_i32 = arith.constant 0 : i32
    %c0_i32_0 = arith.constant 0 : i32
    %c0_i32_1 = arith.constant 0 : i32
    return %c0_i32, %c0_i32_0 : i32, i32
  }
  func.func @transform_6(%arg0: i32) -> (i32, i32) {
    %c0_i32 = arith.constant 0 : i32
    %c0_i32_0 = arith.constant 0 : i32
    %c0_i32_1 = arith.constant 0 : i32
    return %c0_i32, %c0_i32_0 : i32, i32
  }
  func.func @transform_7(%arg0: i32) -> (i32, i32) {
    %c0_i32 = arith.constant 0 : i32
    %c0_i32_0 = arith.constant 0 : i32
    %c0_i32_1 = arith.constant 0 : i32
    return %c0_i32, %c0_i32_0 : i32, i32
  }
  func.func @transform_8(%arg0: i32) -> (i32, i32) {
    %c0_i32 = arith.constant 0 : i32
    %c0_i32_0 = arith.constant 0 : i32
    return %arg0, %c0_i32 : i32, i32
  }
}

</mosaic_0001>

<bundles_post_ra>
// kernel: tpu_custom_call.1
= control target key start
LH: loop header
LB: loop body
LE: loop exit
PB: predicated region body
PF: predicated region fallthrough
CT: control target
= control target key end

     0   :  { %vm93_vm0 = vcmask 1043456   ;;  %vm68_vm1 = vcmask 31744   ;;  %v2190_v20 = vmov 0.0   ;;  %vm229_vm2 = vcmask 261120   ;;  %s2547_s1 = inlined_call_operand.vmem [shape: f32[4,128], index: 1, kind: input, shape index: {}]   ;;  %s2548_s0 = inlined_call_operand.vmem [shape: f32[8,8,4], index: 0, kind: input, shape index: {}]   ;;  %s2549_s2 = inlined_call_operand.vmem [shape: f32[1,128], index: 2, kind: input, shape index: {}]   ;;  %s2550_s3 = inlined_call_operand.vmem [shape: f32[32,256], index: 3, kind: input, shape index: {}]   ;;  %s2551_s5 = inlined_call_operand.vmem [shape: f32[1,128], index: 5, kind: input, shape index: {}]   ;;  %s2552_s4 = inlined_call_operand.vmem [shape: f32[32,128], index: 4, kind: input, shape index: {}]   ;;  %s2553_s6 = inlined_call_operand.vmem [shape: f32[1,32], index: 6, kind: input, shape index: {}]   ;;  %s2554_s7 = inlined_call_operand.<no memory space> [shape: f32[1,1], index: 7, kind: input, shape index: {}]   ;;  %s2555_s8 = inlined_call_operand.vmem [shape: f32[8,1], index: 8, kind: output, shape index: {}]  }
   0x1   :  { %v31_v0 = vld [vmem:[%s2547_s1] sm:$0xf]  ;;  %v55_v2 = vld [vmem:[%s2548_s0 + $0x8] sm:$0xff]  ;;  %s2189_s1 = smov 32   ;;  %v36_v18 = vld [vmem:[%s2550_s3 + $0x18] sm:$0xff]  ;;  %296 = vmatprep.mubr.f32.mxu1 %v2190_v20  ;;  %v2192_v63 = vmov 0.0|0.0  }
   0x2   :  { %v54_v1 = vld [vmem:[%s2548_s0] sm:$0xff]  ;;  %1859 = vmatprep.subr.msk.mxu0 %vm93_vm0, %v31_v0  ;;  %v34_v17 = vld [vmem:[%s2550_s3 + $0x8] sm:$0xff]  ;;  %v35_v22 = vld [vmem:[%s2550_s3 + $0x10] sm:$0xff]  ;;  %vm2193_vm3 = vmmov 0   ;;  %vm1765_vm4 = vcmask 7168  }
   0x3   :  { %1861 = vmatprep.mubr.msk.f32.mxu0 %vm68_vm1, %v54_v1  ;;  %1860 = vmatpush3.msk.msra.mxu0 %vm93_vm0, %v31_v0  ;;  %v2253_v3 = vld [vmem:[%s2549_s2] ss:$0 sm:$0xff]  ;;  %v2271_v21 = vpack.c.bf16 %v36_v18, %v34_v17  ;;  %v38_v23 = vld [vmem:[%s2550_s3 + $0x28] sm:$0xff]  ;;  %v40_v24 = vld [vmem:[%s2550_s3 + $0x38] sm:$0xff] }
   0x4   :  { %1862 = vmatmul.mubr.msk.f32.vlgmr.msra.gmra.mrb[0].mxu0 %vm68_vm1, %v55_v2  ;;  %v33_v19 = vld [vmem:[%s2550_s3] sm:$0xff]  ;;  %v2284_v26 = vpack.c.bf16 %v40_v24, %v38_v23  ;;  %v39_v28 = vld [vmem:[%s2550_s3 + $0x30] sm:$0xff]  ;;  %v57_v61 = vld [vmem:[%s2548_s0 + $0x18] sm:$0xff] }
   0x5   :  { %v2282_v25 = vpack.c.bf16 %v35_v22, %v33_v19  ;;  %v37_v27 = vld [vmem:[%s2550_s3 + $0x20] sm:$0xff]  ;;  %1951 = vmatprep.subr.bf16.mxu1 %v2271_v21  ;;  %1965 = vmatprep.subr.bf16.mxu0 %v2271_v21  ;;  %s2191_s3 = smov 64   ;;  %v56_v60 = vld [vmem:[%s2548_s0 + $0x10] sm:$0xff]  ;;  %v42_v1 = vld [vmem:[%s2552_s4 + $0x8] sm:$0xff] }
   0x6   :  { %v2295_v29 = vpack.c.bf16 %v39_v28, %v37_v27  ;;  %v2310_v35 = vld [vmem:[%s2551_s5] ss:$0 sm:$0xff]  ;;  %1864 = vmatprep.mubr.msk.f32.mxu0 %vm68_vm1, %v56_v60  ;;  %v43_v2 = vld [vmem:[%s2552_s4 + $0x10] sm:$0xff] }
   0x7   :  { %1953 = vmatpush1.bf16.msra.mxu1 %v2282_v25  ;;  %1967 = vmatpush1.bf16.msra.mxu0 %v2282_v25  ;;  %v58_v62 = vld [vmem:[%s2548_s0 + $0x20] sm:$0xff] }
   0x8   :  { %1955 = vmatprep.subr.bf16.mxu1 %v2284_v26  ;;  %1969 = vmatprep.subr.bf16.mxu0 %v2284_v26  ;;  %v41_v0 = vld [vmem:[%s2552_s4] sm:$0xff] }
   0x9   :  { %1865 = vmatmul.mubr.msk.f32.gmra.mrb[2].mxu0 %vm68_vm1, %v57_v61 }
   0xa   :  { %1867 = vmatprep.mubr.msk.f32.mxu0 %vm68_vm1, %v58_v62 }
   0xb   :  { %1957 = vmatpush1.bf16.msra.mxu1 %v2295_v29  ;;  %1971 = vmatpush1.bf16.msra.mxu0 %v2295_v29 }
   0xc   :  { %1979 = vmatprep.subr.bf16.mxu0 %v2271_v21  ;;  %1958 = vmatprep.subr.bf16.mxu1 %v2192_v63 }
  0xd7   :  { %v1863_v4 = vpop.f32.mrb[0].mxu0 }
  0xd8   :  { %v163_v5 = vpop.f32.mrb[1].mxu0  ;;  %v169_v34 = vadd.f32 %v1863_v4, %v2253_v3  ;;  %v59_v4 = vld [vmem:[%s2548_s0 + $0x28] sm:$0xff] }
  0xd9   :  { %v164_v6 = vadd.f32 %v2253_v3, %v163_v5  ;;  %v2349_v5 = vpack.c.bf16 %v42_v1, %v41_v0  ;;  %1868 = vmatmul.mubr.msk.f32.gmra.mrb[4].mxu0 %vm68_vm1, %v59_v4 }
  0xdb   :  { %2061 = vtanh.f32 %v164_v6  ;;  %v1782_v8 = vmul.f32 -1.442695, %v164_v6  ;;  %v44_v6 = vld [vmem:[%s2552_s4 + $0x18] sm:$0xff] }
  0xdd   :  { %2063 = vpow2.f32 %v1782_v8  ;;  %v2358_v8 = vpack.c.bf16 %v44_v6, %v43_v2 }
  0xe5   :  { %v2062_v7 = vpop.eup %2061 }
  0xe6   :  { %211 = vrot.lane.b32.xlu0 %v2062_v7, %s2189_s1  ;;  %v60_v7 = vld [vmem:[%s2548_s0 + $0x30] sm:$0xff] }
  0xe7   :  { %v2064_v9 = vpop.eup %2063  ;;  %1870 = vmatprep.mubr.msk.f32.mxu0 %vm68_vm1, %v60_v7 }
  0xe8   :  { %v205_v10 = vadd.f32 1.0, %v2064_v9  ;;  %v61_v9 = vld [vmem:[%s2548_s0 + $0x38] sm:$0xff] }
  0xe9   :  { %1871 = vmatmul.mubr.msk.f32.gmra.mrb[6].mxu0 %vm68_vm1, %v61_v9 }
  0xea   :  { %2065 = vrcp.f32 %v205_v10  ;;  %498 = vmatprep.mubr.f32.mxu0 %v2190_v20 }
  0xf4   :  { %v2066_v11 = vpop.eup %2065 }
  0xf5   :  { %v209_v14 = vmul.f32 0.0, %v2066_v11 }
 0x158   :  { %v212_v12 = vpop.permute.xlu0 %211 }
 0x159   :  { %v214_v13 = vmul.f32 %v2066_v11, %v212_v12 }
 0x15b   :  { %216 = vrot.lane.b32.xlu0 %v214_v13, %s2189_s1 }
 0x1cd   :  { %v217_v15 = vpop.permute.xlu0 %216 }
 0x1ce   :  { %v2258_v16 = vadd.f32 %v217_v15, %v209_v14 }
 0x1d0   :  { %2067 = vtanh.f32 %v2258_v16 }
 0x1da   :  { %v2068_v30 = vpop.eup %2067 }
 0x1db   :  { %222 = vrot.lane.b32.xlu1 %v2068_v30, %s2189_s1 }
 0x24d   :  { %v223_v31 = vpop.permute.xlu1 %222 }
 0x24e   :  { %v225_v32 = vmul.f32 %v2066_v11, %v223_v31 }
 0x250   :  { %227 = vrot.lane.b32.xlu1 %v225_v32, %s2191_s3 }
 0x2c2   :  { %v228_v33 = vpop.permute.xlu1 %227 }
 0x2c3   :  { %1783 = vmatmul.mubr.msk.f32.vlgmr.msra.gmra.mrb[0].mxu1 %vm229_vm2, %v228_v33 }
 0x2c4   :  { %1960 = vmatpush3.bf16.msra.mxu1 %v2349_v5  ;;  %1881 = vmatprep.mubr.msk.f32.mxu1 %vm2193_vm3, %v2190_v20 }
 0x2c5   :  { %1961 = vmatprep.subr.bf16.mxu1 %v2192_v63 }
 0x2c8   :  { %1963 = vmatpush3.bf16.msra.mxu1 %v2358_v8 }
 0x2c9   :  { %1972 = vmatprep.subr.bf16.mxu1 %v2192_v63 }
 0x396   :  { %v298_v36 = vpop.f32.mrb[0].mxu1 }
 0x397   :  { %v404_v37 = vadd.f32 %v298_v36, %v169_v34  ;;  %v300_v38 = vpop.f32.mrb[1].mxu1 }
 0x398   :  { %v304_v39 = vadd.f32 %v2310_v35, %v300_v38 }
 0x399   :  { %2069 = vtanh.f32 %v404_v37  ;;  %v1786_v42 = vmul.f32 -1.442695, %v404_v37 }
 0x39a   :  { %2071 = vtanh.f32 %v304_v39  ;;  %v1784_v43 = vmul.f32 -1.442695, %v304_v39 }
 0x39b   :  { %2073 = vpow2.f32 %v1786_v42 }
 0x39c   :  { %2075 = vpow2.f32 %v1784_v43 }
 0x3a3   :  { %v2070_v40 = vpop.eup %2069 }
 0x3a4   :  { %v2072_v41 = vpop.eup %2071  ;;  %414 = vrot.lane.b32.xlu0 %v2070_v40, %s2189_s1 }
 0x3a5   :  { %314 = vrot.lane.b32.xlu1 %v2072_v41, %s2189_s1  ;;  %v2074_v44 = vpop.eup %2073 }
 0x3a6   :  { %v2076_v45 = vpop.eup %2075  ;;  %v408_v46 = vadd.f32 1.0, %v2074_v44 }
 0x3a7   :  { %v308_v47 = vadd.f32 1.0, %v2076_v45 }
 0x3a8   :  { %2077 = vrcp.f32 %v408_v46 }
 0x3a9   :  { %2079 = vrcp.f32 %v308_v47 }
 0x3b2   :  { %v2078_v48 = vpop.eup %2077 }
 0x3b3   :  { %v2080_v50 = vpop.eup %2079  ;;  %v412_v54 = vmul.f32 %v2078_v48, %v2258_v16  ;;  %v2376_v16 = vpop.f32.mrb[2].mxu0 }
 0x3b4   :  { %v312_v56 = vmul.f32 0.0, %v2080_v50  ;;  %v173_v17 = vpop.f32.mrb[3].mxu0  ;;  %v179_v4 = vadd.f32 %v2376_v16, %v2253_v3 }
 0x3b5   :  { %v2378_v18 = vpop.f32.mrb[4].mxu0  ;;  %v174_v28 = vadd.f32 %v2253_v3, %v173_v17 }
 0x3b6   :  { %v2380_v19 = vpop.f32.mrb[5].mxu0 }
 0x3b7   :  { %v2382_v22 = vpop.f32.mrb[6].mxu0 }
 0x3b8   :  { %v2384_v23 = vpop.f32.mrb[7].mxu0 }
 0x416   :  { %v415_v49 = vpop.permute.xlu0 %414 }
 0x417   :  { %v417_v51 = vmul.f32 %v2078_v48, %v415_v49  ;;  %v315_v52 = vpop.permute.xlu1 %314 }
 0x418   :  { %v317_v53 = vmul.f32 %v2080_v50, %v315_v52 }
 0x419   :  { %419 = vrot.lane.b32.xlu0 %v417_v51, %s2189_s1 }
 0x41a   :  { %319 = vrot.lane.b32.xlu1 %v317_v53, %s2189_s1 }
 0x48b   :  { %v420_v55 = vpop.permute.xlu0 %419 }
 0x48c   :  { %v2318_v57 = vadd.f32 %v420_v55, %v412_v54  ;;  %v320_v58 = vpop.permute.xlu1 %319 }
 0x48d   :  { %v2320_v59 = vadd.f32 %v320_v58, %v312_v56 }
 0x48e   :  { %2081 = vtanh.f32 %v2318_v57 }
 0x48f   :  { %2083 = vtanh.f32 %v2320_v59 }
 0x498   :  { %v2082_v10 = vpop.eup %2081 }
 0x499   :  { %v2084_v11 = vpop.eup %2083  ;;  %425 = vrot.lane.b32.xlu0 %v2082_v10, %s2189_s1 }
 0x49a   :  { %325 = vrot.lane.b32.xlu1 %v2084_v11, %s2189_s1 }
 0x50b   :  { %v426_v12 = vpop.permute.xlu0 %425 }
 0x50c   :  { %v428_v13 = vmul.f32 %v2078_v48, %v426_v12  ;;  %v326_v14 = vpop.permute.xlu1 %325 }
 0x50d   :  { %v328_v15 = vmul.f32 %v2080_v50, %v326_v14 }
 0x50e   :  { %430 = vrot.lane.b32.xlu0 %v428_v13, %s2191_s3 }
 0x50f   :  { %330 = vrot.lane.b32.xlu1 %v328_v15, %s2191_s3 }
 0x580   :  { %v431_v24 = vpop.permute.xlu0 %430 }
 0x581   :  { %1787 = vmatmul.mubr.msk.f32.vlgmr.msra.gmra.mrb[8].mxu0 %vm229_vm2, %v431_v24  ;;  %v331_v27 = vpop.permute.xlu1 %330 }
 0x582   :  { %1882 = vmatmul.mubr.msk.f32.vlgmr.msra.gmra.mrb[2].mxu1 %vm229_vm2, %v331_v27  ;;  %1981 = vmatpush1.bf16.msra.mxu0 %v2282_v25 }
 0x583   :  { %1974 = vmatpush3.bf16.msra.mxu1 %v2349_v5  ;;  %1983 = vmatprep.subr.bf16.mxu0 %v2284_v26 }
 0x584   :  { %700 = vmatprep.mubr.f32.mxu0 %v2190_v20  ;;  %1975 = vmatprep.subr.bf16.mxu1 %v2192_v63 }
 0x585   :  { %1892 = vmatprep.mubr.msk.f32.mxu1 %vm2193_vm3, %v2190_v20 }
 0x586   :  { %1985 = vmatpush1.bf16.msra.mxu0 %v2295_v29 }
 0x587   :  { %1977 = vmatpush3.bf16.msra.mxu1 %v2358_v8  ;;  %1993 = vmatprep.subr.bf16.mxu0 %v2271_v21 }
 0x588   :  { %1986 = vmatprep.subr.bf16.mxu1 %v2192_v63 }
 0x654   :  { %v500_v30 = vpop.f32.mrb[8].mxu0 }
 0x655   :  { %v606_v31 = vadd.f32 %v500_v30, %v174_v28  ;;  %v400_v32 = vpop.f32.mrb[2].mxu1  ;;  %v502_v33 = vpop.f32.mrb[9].mxu0 }
 0x656   :  { %v505_v34 = vadd.f32 %v502_v33, %v400_v32  ;;  %v1883_v36 = vpop.f32.mrb[3].mxu1 }
 0x657   :  { %2085 = vtanh.f32 %v606_v31  ;;  %v1790_v40 = vmul.f32 -1.442695, %v606_v31 }
 0x658   :  { %v506_v37 = vadd.f32 %v2310_v35, %v505_v34 }
 0x65a   :  { %2087 = vtanh.f32 %v506_v37  ;;  %v1788_v41 = vmul.f32 -1.442695, %v506_v37 }
 0x65b   :  { %2089 = vpow2.f32 %v1790_v40 }
 0x65c   :  { %2091 = vpow2.f32 %v1788_v41 }
 0x661   :  { %v2086_v38 = vpop.eup %2085 }
 0x662   :  { %616 = vrot.lane.b32.xlu0 %v2086_v38, %s2189_s1 }
 0x664   :  { %v2088_v39 = vpop.eup %2087 }
 0x665   :  { %516 = vrot.lane.b32.xlu1 %v2088_v39, %s2189_s1  ;;  %v2090_v42 = vpop.eup %2089 }
 0x666   :  { %v2092_v43 = vpop.eup %2091  ;;  %v610_v44 = vadd.f32 1.0, %v2090_v42 }
 0x667   :  { %v510_v45 = vadd.f32 1.0, %v2092_v43 }
 0x668   :  { %2093 = vrcp.f32 %v610_v44 }
 0x669   :  { %2095 = vrcp.f32 %v510_v45 }
 0x672   :  { %v2094_v46 = vpop.eup %2093 }
 0x673   :  { %v2096_v49 = vpop.eup %2095  ;;  %v614_v52 = vmul.f32 %v2094_v46, %v2318_v57 }
 0x674   :  { %v514_v55 = vmul.f32 %v2096_v49, %v2320_v59 }
 0x6d4   :  { %v617_v47 = vpop.permute.xlu0 %616 }
 0x6d5   :  { %v619_v48 = vmul.f32 %v2094_v46, %v617_v47 }
 0x6d7   :  { %621 = vrot.lane.b32.xlu0 %v619_v48, %s2189_s1  ;;  %v517_v50 = vpop.permute.xlu1 %516 }
 0x6d8   :  { %v519_v51 = vmul.f32 %v2096_v49, %v517_v50 }
 0x6da   :  { %521 = vrot.lane.b32.xlu1 %v519_v51, %s2189_s1 }
 0x749   :  { %v622_v53 = vpop.permute.xlu0 %621 }
 0x74a   :  { %v624_v54 = vadd.f32 %v622_v53, %v614_v52  ;;  %v184_v52 = vadd.f32 %v2253_v3, %v2380_v19 }
 0x74c   :  { %2097 = vtanh.f32 %v624_v54  ;;  %v522_v56 = vpop.permute.xlu1 %521 }
 0x74d   :  { %v524_v58 = vadd.f32 %v522_v56, %v514_v55 }
 0x74f   :  { %2099 = vtanh.f32 %v524_v58 }
 0x756   :  { %v2098_v60 = vpop.eup %2097 }
 0x757   :  { %627 = vrot.lane.b32.xlu0 %v2098_v60, %s2189_s1 }
 0x759   :  { %v2100_v61 = vpop.eup %2099 }
 0x75a   :  { %527 = vrot.lane.b32.xlu1 %v2100_v61, %s2189_s1 }
 0x7c9   :  { %v628_v62 = vpop.permute.xlu0 %627 }
 0x7ca   :  { %v630_v0 = vmul.f32 %v2094_v46, %v628_v62 }
 0x7cc   :  { %632 = vrot.lane.b32.xlu0 %v630_v0, %s2191_s3  ;;  %v528_v1 = vpop.permute.xlu1 %527 }
 0x7cd   :  { %v530_v57 = vmul.f32 %v2096_v49, %v528_v1 }
 0x7cf   :  { %532 = vrot.lane.b32.xlu1 %v530_v57, %s2191_s3 }
 0x83e   :  { %v633_v2 = vpop.permute.xlu0 %632 }
 0x83f   :  { %1791 = vmatmul.mubr.msk.f32.vlgmr.msra.gmra.mrb[10].mxu0 %vm229_vm2, %v633_v2 }
 0x840   :  { %1995 = vmatpush1.bf16.msra.mxu0 %v2282_v25  ;;  %902 = vmatprep.mubr.f32.mxu0 %v2190_v20 }
 0x841   :  { %v533_v59 = vpop.permute.xlu1 %532  ;;  %1997 = vmatprep.subr.bf16.mxu0 %v2284_v26 }
 0x842   :  { %1893 = vmatmul.mubr.msk.f32.vlgmr.msra.gmra.mrb[4].mxu1 %vm229_vm2, %v533_v59 }
 0x843   :  { %1988 = vmatpush3.bf16.msra.mxu1 %v2349_v5  ;;  %1903 = vmatprep.mubr.msk.f32.mxu1 %vm2193_vm3, %v2190_v20 }
 0x844   :  { %1999 = vmatpush1.bf16.msra.mxu0 %v2295_v29  ;;  %1989 = vmatprep.subr.bf16.mxu1 %v2192_v63 }
 0x845   :  { %2007 = vmatprep.subr.bf16.mxu0 %v2271_v21 }
 0x847   :  { %1991 = vmatpush3.bf16.msra.mxu1 %v2358_v8 }
 0x848   :  { %2000 = vmatprep.subr.bf16.mxu1 %v2192_v63 }
 0x912   :  { %v702_v6 = vpop.f32.mrb[10].mxu0 }
 0x913   :  { %v808_v7 = vadd.f32 %v702_v6, %v179_v4  ;;  %v704_v9 = vpop.f32.mrb[11].mxu0 }
 0x915   :  { %2101 = vtanh.f32 %v808_v7  ;;  %v602_v10 = vpop.f32.mrb[4].mxu1  ;;  %v1794_v17 = vmul.f32 -1.442695, %v808_v7 }
 0x916   :  { %v707_v11 = vadd.f32 %v704_v9, %v602_v10  ;;  %v1894_v12 = vpop.f32.mrb[5].mxu1 }
 0x918   :  { %v708_v13 = vadd.f32 %v2310_v35, %v707_v11 }
 0x91a   :  { %2103 = vtanh.f32 %v708_v13  ;;  %v1792_v24 = vmul.f32 -1.442695, %v708_v13 }
 0x91b   :  { %2105 = vpow2.f32 %v1794_v17 }
 0x91c   :  { %2107 = vpow2.f32 %v1792_v24 }
 0x91f   :  { %v2102_v14 = vpop.eup %2101 }
 0x920   :  { %818 = vrot.lane.b32.xlu0 %v2102_v14, %s2189_s1 }
 0x924   :  { %v2104_v15 = vpop.eup %2103 }
 0x925   :  { %718 = vrot.lane.b32.xlu1 %v2104_v15, %s2189_s1  ;;  %v2106_v16 = vpop.eup %2105 }
 0x926   :  { %v812_v27 = vadd.f32 1.0, %v2106_v16  ;;  %v2108_v28 = vpop.eup %2107 }
 0x927   :  { %v712_v30 = vadd.f32 1.0, %v2108_v28 }
 0x928   :  { %2109 = vrcp.f32 %v812_v27 }
 0x929   :  { %2111 = vrcp.f32 %v712_v30 }
 0x932   :  { %v2110_v31 = vpop.eup %2109 }
 0x933   :  { %v2112_v34 = vpop.eup %2111  ;;  %v816_v38 = vmul.f32 %v2110_v31, %v624_v54 }
 0x934   :  { %v716_v41 = vmul.f32 %v2112_v34, %v524_v58 }
 0x992   :  { %v819_v32 = vpop.permute.xlu0 %818 }
 0x993   :  { %v821_v33 = vmul.f32 %v2110_v31, %v819_v32 }
 0x995   :  { %823 = vrot.lane.b32.xlu0 %v821_v33, %s2189_s1 }
 0x997   :  { %v719_v36 = vpop.permute.xlu1 %718 }
 0x998   :  { %v721_v37 = vmul.f32 %v2112_v34, %v719_v36 }
 0x99a   :  { %723 = vrot.lane.b32.xlu1 %v721_v37, %s2189_s1  ;;  %v189_v37 = vadd.f32 %v2378_v18, %v2253_v3 }
 0xa07   :  { %v824_v39 = vpop.permute.xlu0 %823 }
 0xa08   :  { %v826_v40 = vadd.f32 %v824_v39, %v816_v38 }
 0xa0a   :  { %2113 = vtanh.f32 %v826_v40 }
 0xa0c   :  { %v724_v42 = vpop.permute.xlu1 %723 }
 0xa0d   :  { %v726_v43 = vadd.f32 %v724_v42, %v716_v41 }
 0xa0f   :  { %2115 = vtanh.f32 %v726_v43 }
 0xa14   :  { %v2114_v44 = vpop.eup %2113 }
 0xa15   :  { %829 = vrot.lane.b32.xlu0 %v2114_v44, %s2189_s1 }
 0xa19   :  { %v2116_v45 = vpop.eup %2115 }
 0xa1a   :  { %729 = vrot.lane.b32.xlu1 %v2116_v45, %s2189_s1 }
 0xa87   :  { %v830_v46 = vpop.permute.xlu0 %829 }
 0xa88   :  { %v832_v47 = vmul.f32 %v2110_v31, %v830_v46 }
 0xa8a   :  { %834 = vrot.lane.b32.xlu0 %v832_v47, %s2191_s3 }
 0xa8c   :  { %v730_v48 = vpop.permute.xlu1 %729 }
 0xa8d   :  { %v732_v49 = vmul.f32 %v2112_v34, %v730_v48 }
 0xa8f   :  { %734 = vrot.lane.b32.xlu1 %v732_v49, %s2191_s3 }
 0xafc   :  { %v835_v50 = vpop.permute.xlu0 %834 }
 0xafd   :  { %1795 = vmatmul.mubr.msk.f32.vlgmr.msra.gmra.mrb[12].mxu0 %vm229_vm2, %v835_v50 }
 0xafe   :  { %2009 = vmatpush1.bf16.msra.mxu0 %v2282_v25  ;;  %1104 = vmatprep.mubr.f32.mxu0 %v2190_v20 }
 0xaff   :  { %2011 = vmatprep.subr.bf16.mxu0 %v2284_v26 }
 0xb01   :  { %v735_v51 = vpop.permute.xlu1 %734 }
 0xb02   :  { %1904 = vmatmul.mubr.msk.f32.vlgmr.msra.gmra.mrb[6].mxu1 %vm229_vm2, %v735_v51  ;;  %2013 = vmatpush1.bf16.msra.mxu0 %v2295_v29 }
 0xb03   :  { %2002 = vmatpush3.bf16.msra.mxu1 %v2349_v5  ;;  %1914 = vmatprep.mubr.msk.f32.mxu1 %vm2193_vm3, %v2190_v20 }
 0xb04   :  { %2003 = vmatprep.subr.bf16.mxu1 %v2192_v63  ;;  %2021 = vmatprep.subr.bf16.mxu0 %v2271_v21 }
 0xb07   :  { %2005 = vmatpush3.bf16.msra.mxu1 %v2358_v8 }
 0xb08   :  { %2014 = vmatprep.subr.bf16.mxu1 %v2192_v63 }
 0xbd0   :  { %v904_v53 = vpop.f32.mrb[12].mxu0 }
 0xbd1   :  { %v1010_v54 = vadd.f32 %v904_v53, %v184_v52  ;;  %v906_v55 = vpop.f32.mrb[13].mxu0 }
 0xbd3   :  { %2117 = vtanh.f32 %v1010_v54  ;;  %v1798_v1 = vmul.f32 -1.442695, %v1010_v54 }
 0xbd5   :  { %v804_v56 = vpop.f32.mrb[6].mxu1 }
 0xbd6   :  { %v909_v58 = vadd.f32 %v906_v55, %v804_v56  ;;  %v1905_v60 = vpop.f32.mrb[7].mxu1 }
 0xbd8   :  { %v910_v61 = vadd.f32 %v2310_v35, %v909_v58 }
 0xbda   :  { %2119 = vtanh.f32 %v910_v61  ;;  %v1796_v57 = vmul.f32 -1.442695, %v910_v61 }
 0xbdb   :  { %2121 = vpow2.f32 %v1798_v1 }
 0xbdc   :  { %2123 = vpow2.f32 %v1796_v57 }
 0xbdd   :  { %v2118_v62 = vpop.eup %2117 }
 0xbde   :  { %1020 = vrot.lane.b32.xlu0 %v2118_v62, %s2189_s1 }
 0xbe4   :  { %v2120_v0 = vpop.eup %2119 }
 0xbe5   :  { %920 = vrot.lane.b32.xlu1 %v2120_v0, %s2189_s1  ;;  %v2122_v19 = vpop.eup %2121 }
 0xbe6   :  { %v1014_v2 = vadd.f32 1.0, %v2122_v19  ;;  %v2124_v59 = vpop.eup %2123 }
 0xbe7   :  { %v914_v4 = vadd.f32 1.0, %v2124_v59 }
 0xbe8   :  { %2125 = vrcp.f32 %v1014_v2 }
 0xbe9   :  { %2127 = vrcp.f32 %v914_v4 }
 0xbf2   :  { %v2126_v6 = vpop.eup %2125 }
 0xbf3   :  { %v2128_v10 = vpop.eup %2127  ;;  %v1018_v13 = vmul.f32 %v2126_v6, %v826_v40 }
 0xbf4   :  { %v918_v17 = vmul.f32 %v2128_v10, %v726_v43 }
 0xc50   :  { %v1021_v7 = vpop.permute.xlu0 %1020 }
 0xc51   :  { %v1023_v9 = vmul.f32 %v2126_v6, %v1021_v7 }
 0xc53   :  { %1025 = vrot.lane.b32.xlu0 %v1023_v9, %s2189_s1 }
 0xc57   :  { %v921_v11 = vpop.permute.xlu1 %920 }
 0xc58   :  { %v923_v12 = vmul.f32 %v2128_v10, %v921_v11  ;;  %v194_v11 = vadd.f32 %v2253_v3, %v2384_v23 }
 0xc5a   :  { %925 = vrot.lane.b32.xlu1 %v923_v12, %s2189_s1 }
 0xcc5   :  { %v1026_v14 = vpop.permute.xlu0 %1025 }
 0xcc6   :  { %v1028_v15 = vadd.f32 %v1026_v14, %v1018_v13 }
 0xcc8   :  { %2129 = vtanh.f32 %v1028_v15 }
 0xccc   :  { %v926_v24 = vpop.permute.xlu1 %925 }
 0xccd   :  { %v928_v16 = vadd.f32 %v926_v24, %v918_v17 }
 0xccf   :  { %2131 = vtanh.f32 %v928_v16 }
 0xcd2   :  { %v2130_v27 = vpop.eup %2129 }
 0xcd3   :  { %1031 = vrot.lane.b32.xlu0 %v2130_v27, %s2189_s1 }
 0xcd9   :  { %v2132_v28 = vpop.eup %2131 }
 0xcda   :  { %931 = vrot.lane.b32.xlu1 %v2132_v28, %s2189_s1 }
 0xd45   :  { %v1032_v30 = vpop.permute.xlu0 %1031 }
 0xd46   :  { %v1034_v31 = vmul.f32 %v2126_v6, %v1032_v30 }
 0xd48   :  { %1036 = vrot.lane.b32.xlu0 %v1034_v31, %s2191_s3 }
 0xd4c   :  { %v932_v32 = vpop.permute.xlu1 %931 }
 0xd4d   :  { %v934_v33 = vmul.f32 %v2128_v10, %v932_v32 }
 0xd4f   :  { %936 = vrot.lane.b32.xlu1 %v934_v33, %s2191_s3 }
 0xdba   :  { %v1037_v34 = vpop.permute.xlu0 %1036 }
 0xdbb   :  { %1799 = vmatmul.mubr.msk.f32.vlgmr.msra.gmra.mrb[14].mxu0 %vm229_vm2, %v1037_v34 }
 0xdbc   :  { %2023 = vmatpush1.bf16.msra.mxu0 %v2282_v25  ;;  %1306 = vmatprep.mubr.f32.mxu0 %v2190_v20 }
 0xdbd   :  { %2025 = vmatprep.subr.bf16.mxu0 %v2284_v26 }
 0xdc0   :  { %2027 = vmatpush1.bf16.msra.mxu0 %v2295_v29 }
 0xdc1   :  { %v937_v36 = vpop.permute.xlu1 %936  ;;  %2035 = vmatprep.subr.bf16.mxu0 %v2271_v21 }
 0xdc2   :  { %1915 = vmatmul.mubr.msk.f32.vlgmr.msra.gmra.mrb[8].mxu1 %vm229_vm2, %v937_v36 }
 0xdc3   :  { %2016 = vmatpush3.bf16.msra.mxu1 %v2349_v5  ;;  %1925 = vmatprep.mubr.msk.f32.mxu1 %vm2193_vm3, %v2190_v20 }
 0xdc4   :  { %2017 = vmatprep.subr.bf16.mxu1 %v2192_v63 }
 0xdc7   :  { %2019 = vmatpush3.bf16.msra.mxu1 %v2358_v8 }
 0xdc8   :  { %2028 = vmatprep.subr.bf16.mxu1 %v2192_v63 }
 0xe8e   :  { %v1106_v38 = vpop.f32.mrb[14].mxu0 }
 0xe8f   :  { %v1212_v39 = vadd.f32 %v1106_v38, %v189_v37  ;;  %v1108_v40 = vpop.f32.mrb[15].mxu0 }
 0xe91   :  { %2133 = vtanh.f32 %v1212_v39  ;;  %v1802_v47 = vmul.f32 -1.442695, %v1212_v39 }
 0xe95   :  { %v1006_v41 = vpop.f32.mrb[8].mxu1 }
 0xe96   :  { %v1111_v42 = vadd.f32 %v1108_v40, %v1006_v41  ;;  %v1916_v43 = vpop.f32.mrb[9].mxu1 }
 0xe98   :  { %v1112_v44 = vadd.f32 %v2310_v35, %v1111_v42 }
 0xe9a   :  { %2135 = vtanh.f32 %v1112_v44  ;;  %v1800_v48 = vmul.f32 -1.442695, %v1112_v44 }
 0xe9b   :  { %v2134_v45 = vpop.eup %2133  ;;  %2137 = vpow2.f32 %v1802_v47 }
 0xe9c   :  { %1222 = vrot.lane.b32.xlu0 %v2134_v45, %s2189_s1  ;;  %2139 = vpow2.f32 %v1800_v48 }
 0xea4   :  { %v2136_v46 = vpop.eup %2135 }
 0xea5   :  { %1122 = vrot.lane.b32.xlu1 %v2136_v46, %s2189_s1  ;;  %v2138_v18 = vpop.eup %2137 }
 0xea6   :  { %v1216_v49 = vadd.f32 1.0, %v2138_v18  ;;  %v2140_v50 = vpop.eup %2139 }
 0xea7   :  { %v1116_v51 = vadd.f32 1.0, %v2140_v50 }
 0xea8   :  { %2141 = vrcp.f32 %v1216_v49 }
 0xea9   :  { %2143 = vrcp.f32 %v1116_v51 }
 0xeb2   :  { %v2142_v52 = vpop.eup %2141 }
 0xeb3   :  { %v2144_v55 = vpop.eup %2143  ;;  %v1220_v60 = vmul.f32 %v2142_v52, %v1028_v15 }
 0xeb4   :  { %v1120_v0 = vmul.f32 %v2144_v55, %v928_v16 }
 0xf0e   :  { %v1223_v53 = vpop.permute.xlu0 %1222 }
 0xf0f   :  { %v1225_v54 = vmul.f32 %v2142_v52, %v1223_v53 }
 0xf11   :  { %1227 = vrot.lane.b32.xlu0 %v1225_v54, %s2189_s1 }
 0xf17   :  { %v1123_v56 = vpop.permute.xlu1 %1122 }
 0xf18   :  { %v1125_v58 = vmul.f32 %v2144_v55, %v1123_v56 }
 0xf1a   :  { %1127 = vrot.lane.b32.xlu1 %v1125_v58, %s2189_s1 }
 0xf83   :  { %v1228_v61 = vpop.permute.xlu0 %1227 }
 0xf84   :  { %v1230_v62 = vadd.f32 %v1228_v61, %v1220_v60 }
 0xf86   :  { %2145 = vtanh.f32 %v1230_v62 }
 0xf8c   :  { %v1128_v1 = vpop.permute.xlu1 %1127 }
 0xf8d   :  { %v1130_v57 = vadd.f32 %v1128_v1, %v1120_v0 }
 0xf8f   :  { %2147 = vtanh.f32 %v1130_v57 }
 0xf90   :  { %v2146_v19 = vpop.eup %2145 }
 0xf91   :  { %1233 = vrot.lane.b32.xlu0 %v2146_v19, %s2189_s1 }
 0xf99   :  { %v2148_v2 = vpop.eup %2147 }
 0xf9a   :  { %1133 = vrot.lane.b32.xlu1 %v2148_v2, %s2189_s1 }
0x1003   :  { %v1234_v59 = vpop.permute.xlu0 %1233 }
0x1004   :  { %v1236_v4 = vmul.f32 %v2142_v52, %v1234_v59 }
0x1006   :  { %1238 = vrot.lane.b32.xlu0 %v1236_v4, %s2191_s3 }
0x100c   :  { %v1134_v6 = vpop.permute.xlu1 %1133 }
0x100d   :  { %v1136_v7 = vmul.f32 %v2144_v55, %v1134_v6 }
0x100f   :  { %1138 = vrot.lane.b32.xlu1 %v1136_v7, %s2191_s3 }
0x1078   :  { %v1239_v9 = vpop.permute.xlu0 %1238 }
0x1079   :  { %1803 = vmatmul.mubr.msk.f32.vlgmr.msra.gmra.mrb[16].mxu0 %vm229_vm2, %v1239_v9 }
0x107a   :  { %2037 = vmatpush1.bf16.msra.mxu0 %v2282_v25  ;;  %1508 = vmatprep.mubr.f32.mxu0 %v2190_v20 }
0x107b   :  { %2039 = vmatprep.subr.bf16.mxu0 %v2284_v26 }
0x107e   :  { %2041 = vmatpush1.bf16.msra.mxu0 %v2295_v29 }
0x107f   :  { %2049 = vmatprep.subr.bf16.mxu0 %v2271_v21 }
0x1081   :  { %v1139_v10 = vpop.permute.xlu1 %1138 }
0x1082   :  { %1926 = vmatmul.mubr.msk.f32.vlgmr.msra.gmra.mrb[10].mxu1 %vm229_vm2, %v1139_v10 }
0x1083   :  { %2030 = vmatpush3.bf16.msra.mxu1 %v2349_v5  ;;  %1936 = vmatprep.mubr.msk.f32.mxu1 %vm2193_vm3, %v2190_v20 }
0x1084   :  { %2031 = vmatprep.subr.bf16.mxu1 %v2192_v63 }
0x1087   :  { %2033 = vmatpush3.bf16.msra.mxu1 %v2358_v8 }
0x1088   :  { %2042 = vmatprep.subr.bf16.mxu1 %v2192_v63 }
0x114c   :  { %v1308_v12 = vpop.f32.mrb[16].mxu0 }
0x114d   :  { %v1414_v13 = vadd.f32 %v1308_v12, %v194_v11  ;;  %v1310_v21 = vpop.f32.mrb[17].mxu0 }
0x114f   :  { %2149 = vtanh.f32 %v1414_v13  ;;  %v1806_v28 = vmul.f32 -1.442695, %v1414_v13 }
0x1155   :  { %v1208_v14 = vpop.f32.mrb[10].mxu1 }
0x1156   :  { %v1313_v15 = vadd.f32 %v1310_v21, %v1208_v14  ;;  %v1927_v17 = vpop.f32.mrb[11].mxu1 }
0x1158   :  { %v1314_v24 = vadd.f32 %v2310_v35, %v1313_v15 }
0x1159   :  { %v2150_v16 = vpop.eup %2149 }
0x115a   :  { %2151 = vtanh.f32 %v1314_v24  ;;  %1424 = vrot.lane.b32.xlu0 %v2150_v16, %s2189_s1  ;;  %v1804_v30 = vmul.f32 -1.442695, %v1314_v24 }
0x115b   :  { %2153 = vpow2.f32 %v1806_v28 }
0x115c   :  { %2155 = vpow2.f32 %v1804_v30 }
0x1164   :  { %v2152_v27 = vpop.eup %2151 }
0x1165   :  { %1324 = vrot.lane.b32.xlu1 %v2152_v27, %s2189_s1  ;;  %v2154_v23 = vpop.eup %2153 }
0x1166   :  { %v1418_v31 = vadd.f32 1.0, %v2154_v23  ;;  %v2156_v32 = vpop.eup %2155 }
0x1167   :  { %v1318_v33 = vadd.f32 1.0, %v2156_v32 }
0x1168   :  { %2157 = vrcp.f32 %v1418_v31 }
0x1169   :  { %2159 = vrcp.f32 %v1318_v33 }
0x1172   :  { %v2158_v34 = vpop.eup %2157 }
0x1173   :  { %v2160_v38 = vpop.eup %2159  ;;  %v1422_v41 = vmul.f32 %v2158_v34, %v1230_v62 }
0x1174   :  { %v1322_v44 = vmul.f32 %v2160_v38, %v1130_v57 }
0x11cc   :  { %v1425_v36 = vpop.permute.xlu0 %1424 }
0x11cd   :  { %v1427_v37 = vmul.f32 %v2158_v34, %v1425_v36 }
0x11cf   :  { %1429 = vrot.lane.b32.xlu0 %v1427_v37, %s2189_s1 }
0x11d7   :  { %v1325_v39 = vpop.permute.xlu1 %1324 }
0x11d8   :  { %v1327_v40 = vmul.f32 %v2160_v38, %v1325_v39 }
0x11da   :  { %1329 = vrot.lane.b32.xlu1 %v1327_v40, %s2189_s1 }
0x1241   :  { %v1430_v42 = vpop.permute.xlu0 %1429 }
0x1242   :  { %v1432_v43 = vadd.f32 %v1430_v42, %v1422_v41  ;;  %v1813_v41 = vld [vmem:[%s2553_s6] ss:$0 sm:$0xff] }
0x1244   :  { %2161 = vtanh.f32 %v1432_v43 }
0x124c   :  { %v1330_v45 = vpop.permute.xlu1 %1329 }
0x124d   :  { %v1332_v46 = vadd.f32 %v1330_v45, %v1322_v44  ;;  %v13_v45 = vstv %s2554_s7 }
0x124e   :  { %v2162_v47 = vpop.eup %2161  ;;  %14 = vst [vmem:[#allocation2] sm:$0x1] %v13_v45 }
0x124f   :  { %2163 = vtanh.f32 %v1332_v46  ;;  %1435 = vrot.lane.b32.xlu0 %v2162_v47, %s2189_s1 }
0x1259   :  { %v2164_v48 = vpop.eup %2163 }
0x125a   :  { %1335 = vrot.lane.b32.xlu1 %v2164_v48, %s2189_s1 }
0x12c1   :  { %v1436_v18 = vpop.permute.xlu0 %1435 }
0x12c2   :  { %v1438_v49 = vmul.f32 %v2158_v34, %v1436_v18 }
0x12c4   :  { %1440 = vrot.lane.b32.xlu0 %v1438_v49, %s2191_s3 }
0x12cc   :  { %v1336_v50 = vpop.permute.xlu1 %1335 }
0x12cd   :  { %v1338_v51 = vmul.f32 %v2160_v38, %v1336_v50 }
0x12cf   :  { %1340 = vrot.lane.b32.xlu1 %v1338_v51, %s2191_s3  ;;  %v1814_v51 = vld [vmem:[#allocation2] ss:$0 sm:$0xff] }
0x1336   :  { %v1441_v52 = vpop.permute.xlu0 %1440 }
0x1337   :  { %1807 = vmatmul.mubr.msk.f32.vlgmr.msra.gmra.mrb[18].mxu0 %vm229_vm2, %v1441_v52 }
0x1338   :  { %2051 = vmatpush1.bf16.msra.mxu0 %v2282_v25  ;;  %1710 = vmatprep.mubr.f32.mxu0 %v2190_v20  ;;  %v199_v25 = vadd.f32 %v2382_v22, %v2253_v3 }
0x1339   :  { %2053 = vmatprep.subr.bf16.mxu0 %v2284_v26 }
0x133c   :  { %2055 = vmatpush1.bf16.msra.mxu0 %v2295_v29 }
0x1341   :  { %v1341_v53 = vpop.permute.xlu1 %1340 }
0x1342   :  { %1937 = vmatmul.mubr.msk.f32.vlgmr.msra.gmra.mrb[12].mxu1 %vm229_vm2, %v1341_v53 }
0x1343   :  { %2044 = vmatpush3.bf16.msra.mxu1 %v2349_v5  ;;  %1947 = vmatprep.mubr.msk.f32.mxu1 %vm2193_vm3, %v2190_v20 }
0x1344   :  { %2045 = vmatprep.subr.bf16.mxu1 %v2192_v63 }
0x1347   :  { %2047 = vmatpush3.bf16.msra.mxu1 %v2358_v8 }
0x140a   :  { %v1510_v54 = vpop.f32.mrb[18].mxu0 }
0x140b   :  { %v1616_v55 = vadd.f32 %v1510_v54, %v199_v25  ;;  %v1512_v26 = vpop.f32.mrb[19].mxu0 }
0x140d   :  { %2165 = vtanh.f32 %v1616_v55  ;;  %v1810_v63 = vmul.f32 -1.442695, %v1616_v55 }
0x1415   :  { %v1410_v29 = vpop.f32.mrb[12].mxu1 }
0x1416   :  { %v1515_v56 = vadd.f32 %v1512_v26, %v1410_v29  ;;  %v1938_v58 = vpop.f32.mrb[13].mxu1 }
0x1417   :  { %v2166_v60 = vpop.eup %2165 }
0x1418   :  { %v1516_v5 = vadd.f32 %v2310_v35, %v1515_v56  ;;  %1626 = vrot.lane.b32.xlu0 %v2166_v60, %s2189_s1 }
0x141a   :  { %2167 = vtanh.f32 %v1516_v5  ;;  %v1808_v8 = vmul.f32 -1.442695, %v1516_v5 }
0x141b   :  { %2169 = vpow2.f32 %v1810_v63 }
0x141c   :  { %2171 = vpow2.f32 %v1808_v8 }
0x1424   :  { %v2168_v20 = vpop.eup %2167 }
0x1425   :  { %1526 = vrot.lane.b32.xlu1 %v2168_v20, %s2189_s1  ;;  %v2170_v3 = vpop.eup %2169 }
0x1426   :  { %v1620_v22 = vadd.f32 1.0, %v2170_v3  ;;  %v2172_v61 = vpop.eup %2171 }
0x1427   :  { %v1520_v62 = vadd.f32 1.0, %v2172_v61 }
0x1428   :  { %2173 = vrcp.f32 %v1620_v22 }
0x1429   :  { %2175 = vrcp.f32 %v1520_v62 }
0x1432   :  { %v2174_v0 = vpop.eup %2173 }
0x1433   :  { %v2176_v19 = vpop.eup %2175  ;;  %v1624_v4 = vmul.f32 %v2174_v0, %v1432_v43 }
0x1434   :  { %v1524_v9 = vmul.f32 %v2176_v19, %v1332_v46 }
0x148a   :  { %v1627_v1 = vpop.permute.xlu0 %1626 }
0x148b   :  { %v1629_v57 = vmul.f32 %v2174_v0, %v1627_v1 }
0x148d   :  { %1631 = vrot.lane.b32.xlu0 %v1629_v57, %s2189_s1 }
0x1497   :  { %v1527_v2 = vpop.permute.xlu1 %1526 }
0x1498   :  { %v1529_v59 = vmul.f32 %v2176_v19, %v1527_v2 }
0x149a   :  { %1531 = vrot.lane.b32.xlu1 %v1529_v59, %s2189_s1 }
0x14ff   :  { %v1632_v6 = vpop.permute.xlu0 %1631 }
0x1500   :  { %v1634_v7 = vadd.f32 %v1632_v6, %v1624_v4 }
0x1502   :  { %2177 = vtanh.f32 %v1634_v7 }
0x150c   :  { %v2178_v10 = vpop.eup %2177  ;;  %v1532_v11 = vpop.permute.xlu1 %1531 }
0x150d   :  { %v1534_v12 = vadd.f32 %v1532_v11, %v1524_v9  ;;  %1637 = vrot.lane.b32.xlu0 %v2178_v10, %s2189_s1 }
0x150f   :  { %2179 = vtanh.f32 %v1534_v12 }
0x1519   :  { %v2180_v13 = vpop.eup %2179 }
0x151a   :  { %1537 = vrot.lane.b32.xlu1 %v2180_v13, %s2189_s1 }
0x157f   :  { %v1638_v21 = vpop.permute.xlu0 %1637 }
0x1580   :  { %v1640_v14 = vmul.f32 %v2174_v0, %v1638_v21 }
0x1582   :  { %1642 = vrot.lane.b32.xlu0 %v1640_v14, %s2191_s3 }
0x158c   :  { %v1538_v15 = vpop.permute.xlu1 %1537 }
0x158d   :  { %v1540_v17 = vmul.f32 %v2176_v19, %v1538_v15 }
0x158f   :  { %1542 = vrot.lane.b32.xlu1 %v1540_v17, %s2191_s3 }
0x15f4   :  { %v1643_v24 = vpop.permute.xlu0 %1642 }
0x15f5   :  { %1811 = vmatmul.mubr.msk.f32.vlgmr.msra.gmra.mrb[20].mxu0 %vm229_vm2, %v1643_v24 }
0x1601   :  { %v1543_v16 = vpop.permute.xlu1 %1542 }
0x1602   :  { %1948 = vmatmul.mubr.msk.f32.vlgmr.msra.gmra.mrb[14].mxu1 %vm229_vm2, %v1543_v16 }
0x16c8   :  { %v1712_v27 = vpop.f32.mrb[20].mxu0 }
0x16c9   :  { %v1713_v28 = vpop.f32.mrb[21].mxu0 }
0x16d5   :  { %v1612_v30 = vpop.f32.mrb[14].mxu1 }
0x16d6   :  { %v1716_v23 = vadd.f32 %v1713_v28, %v1612_v30  ;;  %v1949_v31 = vpop.f32.mrb[15].mxu1 }
0x16d8   :  { %v1717_v32 = vadd.f32 %v2310_v35, %v1716_v23 }
0x16da   :  { %2181 = vtanh.f32 %v1717_v32  ;;  %v1812_v34 = vmul.f32 -1.442695, %v1717_v32 }
0x16dc   :  { %2183 = vpow2.f32 %v1812_v34 }
0x16e4   :  { %v2182_v33 = vpop.eup %2181 }
0x16e5   :  { %1727 = vrot.lane.b32.xlu0 %v2182_v33, %s2189_s1 }
0x16e6   :  { %v2184_v36 = vpop.eup %2183 }
0x16e7   :  { %v1721_v37 = vadd.f32 1.0, %v2184_v36 }
0x16e9   :  { %2185 = vrcp.f32 %v1721_v37 }
0x16f3   :  { %v2186_v38 = vpop.eup %2185 }
0x16f4   :  { %v1725_v35 = vmul.f32 %v2186_v38, %v1534_v12 }
0x1757   :  { %v1728_v39 = vpop.permute.xlu0 %1727 }
0x1758   :  { %v1730_v40 = vmul.f32 %v2186_v38, %v1728_v39 }
0x175a   :  { %1732 = vrot.lane.b32.xlu1 %v1730_v40, %s2189_s1 }
0x175e   :  { %1747 = vrot.lane.b32.xlu1 %v1813_v41, %s2191_s3 }
0x17cc   :  { %v1733_v42 = vpop.permute.xlu1 %1732 }
0x17cd   :  { %v1735_v43 = vadd.f32 %v1733_v42, %v1725_v35 }
0x17cf   :  { %2187 = vtanh.f32 %v1735_v43 }
0x17d0   :  { %v1748_v47 = vpop.permute.xlu1 %1747 }
0x17d9   :  { %v2188_v44 = vpop.eup %2187 }
0x17da   :  { %1738 = vrot.lane.b32.xlu0 %v2188_v44, %s2189_s1 }
0x184c   :  { %v1739_v46 = vpop.permute.xlu0 %1738 }
0x184d   :  { %v1741_v48 = vmul.f32 %v2186_v38, %v1739_v46 }
0x184f   :  { %v1750_v18 = vmul.f32 %v1748_v47, %v1741_v48 }
0x1851   :  { %1752 = vrot.lane.b32.xlu0 %v1750_v18, %s2191_s3 }
0x18c3   :  { %v1753_v49 = vpop.permute.xlu0 %1752 }
0x18c4   :  { %v1755_v50 = vsel %vm229_vm2, %v1753_v49, 0.0 }
0x18c5   :  { %1756 = vadd.xlane.f32.xlu1 %v1755_v50 }
0x1952   :  { %v1757_v52 = vpop.xlane.xlu1 %1756 }
0x1953   :  { %v1764_v53 = vadd.f32 %v1814_v51, %v1757_v52 }
0x1955   :  { %1766 = vst.msk [vmem:[%s2555_s8] sm:$0xff] %vm1765_vm4, %v1764_v53 }

</bundles_post_ra>
